<compile_context>
chip_gen: v5e
topology: v5e:2x2
jax: 0.10.0
libtpu: 0.0.40
codegen_flags: <defaults>
</compile_context>

<pallas_src>
import math
import numpy as np
import jax
import jax.numpy as jnp
from jax.experimental import pallas as pl
from jax.experimental.pallas import tpu as pltpu


def _round_up(x, m):
    return ((x + m - 1) // m) * m


def _cdiv(a, b):
    return (a + b - 1) // b


def _make_inr_kernel(depth, in_dim, pe_half):
    """Kernel closure for a fixed (static) depth / in_dim / pe_half.

    Layout: pixels (N) on the lane axis, feature dims on sublanes.
      coords_ref : (1, in_dim, TILE_N)
      bpe_ref    : (pe_half, in_dim)             -- already scaled by 2*pi
      layer 0    : w0 (1, h0, pe_dim), b0 (1, h0, 1)
      layer i>=1 : w_i (1, d_out, d_in), b_i (1, d_out, 1)
      out_ref    : (1, out_dim, TILE_N)
      feat_ref   : (pe_dim, TILE_N) VMEM scratch holding [sin; cos]
    """
    n_params = 2 * depth
    pe_dim = 2 * pe_half

    def kernel(coords_ref, bpe_ref, *refs):
        params = refs[:n_params]
        out_ref = refs[n_params]
        feat_ref = refs[n_params + 1]        # (pe_dim, TILE_N)

        xt = coords_ref[0]                   # (in_dim, TILE_N)
        bt = bpe_ref[...]                    # (pe_half, in_dim), pre-scaled by 2*pi

        # Fourier projection as VPU broadcast-FMAs (contraction K = in_dim is
        # tiny; avoids a serialized K=2 MXU push/pop round-trip).
        proj = bt[:, 0:1] * xt[0:1, :]       # (pe_half, TILE_N)
        for d in range(1, in_dim):
            proj = proj + bt[:, d:d + 1] * xt[d:d + 1, :]

        # sin/cos written into one (pe_dim, TILE_N) scratch (sublane "concat",
        # not a lane concat) so layer 0 is a single K=pe_dim matmul.
        feat_ref[0:pe_half, :] = jnp.sin(proj)
        feat_ref[pe_half:pe_dim, :] = jnp.cos(proj)

        # Layer 0: one accumulating dot over the merged sin/cos features.
        w0 = params[0][0]                    # (h0, pe_dim)
        b0 = params[1][0]                    # (h0, 1)
        h = jnp.dot(w0, feat_ref[...], preferred_element_type=jnp.float32) + b0
        if depth > 1:
            h = jnp.maximum(h, 0.0)

        # Remaining layers (weights pre-transposed, bias pre-split, out_bias
        # folded into the last bias by the wrapper).
        for i in range(1, depth):
            w = params[2 * i][0]             # (d_out, d_in)
            b = params[2 * i + 1][0]         # (d_out, 1)
            h = jnp.dot(w, h, preferred_element_type=jnp.float32) + b
            if i < depth - 1:
                h = jnp.maximum(h, 0.0)

        out_ref[0] = h.astype(out_ref.dtype)

    return kernel


def inr_mlp_forward(coords, bpe, wbs, *, out_bias=0.0, tile_n=8192):
    """
    coords : (B, H, W, in_dim) float32   (PyTorch forward input)
    bpe    : (in_dim, pe_dim // 2) float32   (LearnableFourierFeatures.B)
    wbs    : list of (B, D_in + 1, D_out) float32   (params['wb{i}'], last row = bias)
    """
    B, H, W, in_dim = coords.shape
    N = H * W
    pe_half = int(bpe.shape[1])
    pe_dim = 2 * pe_half
    depth = len(wbs)
    layer_dims = [int(wb.shape[-1]) for wb in wbs]
    out_dim = layer_dims[-1]

    # ---- pixel-axis tiling (cdiv-derived: padding per tile < 128 columns) ----
    num_n = max(1, _cdiv(N, tile_n))
    if B * num_n < 2 and N > 128:
        num_n = 2          # keep >= 2 grid steps so both v7x TensorCores get work
    TILE_N = _round_up(_cdiv(N, num_n), 128)
    N_pad = num_n * TILE_N

    # coords -> (B, in_dim, N_pad): pixels on the fast lane axis.
    # TODO(synk): for regular-grid INR queries the coords (and this transpose /
    # the final output transpose) could be generated/consumed channel-major and
    # the coords built in-kernel from iota; kept generic to match the module API.
    coords_t = jnp.transpose(coords.reshape(B, N, in_dim), (0, 2, 1))
    if N_pad != N:
        coords_t = jnp.pad(coords_t, ((0, 0), (0, 0), (0, N_pad - N)))

    # Fold 2*pi into the Fourier matrix; transpose to (pe_half, in_dim).
    bpe_t = (2.0 * jnp.pi) * bpe.T

    # Split every wb into a pre-transposed weight (B, d_out, d_in) and a bias
    # (B, d_out, 1); out_bias folded into the last bias.
    wb0 = wbs[0]
    w0 = jnp.transpose(wb0[:, :pe_dim, :], (0, 2, 1))            # (B, h0, pe_dim)
    b0 = jnp.transpose(wb0[:, pe_dim:pe_dim + 1, :], (0, 2, 1))  # (B, h0, 1)
    if depth == 1:
        b0 = b0 + out_bias
    params = [w0, b0]
    last = layer_dims[0]
    for i in range(1, depth):
        wb = wbs[i]
        w = jnp.transpose(wb[:, :last, :], (0, 2, 1))            # (B, d_out, d_in)
        b = jnp.transpose(wb[:, last:last + 1, :], (0, 2, 1))    # (B, d_out, 1)
        if i == depth - 1:
            b = b + out_bias
        params.append(w)
        params.append(b)
        last = layer_dims[i]

    kernel = _make_inr_kernel(depth, in_dim, pe_half)

    in_specs = [
        pl.BlockSpec((1, in_dim, TILE_N), lambda b, n: (b, 0, n)),   # coords (N-tiled)
        pl.BlockSpec((pe_half, in_dim), lambda b, n: (0, 0)),        # Fourier B (shared)
    ]
    for p in params:
        d0, d1 = int(p.shape[1]), int(p.shape[2])
        # Per-batch, N-invariant: weights stay resident across the inner N axis.
        in_specs.append(pl.BlockSpec((1, d0, d1), lambda b, n: (b, 0, 0)))

    # ---- explicit VMEM budget (v5e scoped default 16 MiB; v7x physical 64 MiB)
    max_h = max(layer_dims)
    live_rows = (in_dim + pe_half + pe_dim + 2 * max_h          # intermediates
                 + 2 * (in_dim + out_dim))                      # double-buffered I/O
    param_bytes = sum(int(np.prod(p.shape)) * 4 for p in params) + int(bpe_t.size) * 4
    est_vmem = 4 * TILE_N * live_rows + 2 * param_bytes
    vmem_limit = int(min(max(2 * est_vmem, 32 * 1024 * 1024), 48 * 1024 * 1024))

    # Advisory cost estimate (kernel is EUP / memory bound at these widths).
    flops_per_pt = 2 * in_dim * pe_half + 2 * pe_dim * layer_dims[0]
    prev = layer_dims[0]
    for i in range(1, depth):
        flops_per_pt += 2 * prev * layer_dims[i]
        prev = layer_dims[i]
    cost = pl.CostEstimate(
        flops=int(B * N_pad * flops_per_pt),
        transcendentals=int(B * N_pad * pe_dim),
        bytes_accessed=int(B * N_pad * (in_dim + out_dim) * 4 + param_bytes),
    )

    out_t = pl.pallas_call(
        kernel,
        out_shape=jax.ShapeDtypeStruct((B, out_dim, N_pad), jnp.float32),
        grid_spec=pltpu.PrefetchScalarGridSpec(
            num_scalar_prefetch=0,
            grid=(B, num_n),
            in_specs=in_specs,
            out_specs=pl.BlockSpec((1, out_dim, TILE_N), lambda b, n: (b, 0, n)),
            scratch_shapes=[pltpu.VMEM((pe_dim, TILE_N), jnp.float32)],
        ),
        compiler_params=pltpu.CompilerParams(
            dimension_semantics=("parallel", "parallel"),
            vmem_limit_bytes=vmem_limit,
        ),
        cost_estimate=cost,
    )(coords_t, bpe_t, *params)

    out = jnp.transpose(out_t[:, :, :N], (0, 2, 1)).reshape(B, H, W, out_dim)
    return out


def _reference_forward(coords, bpe, wbs, out_bias):
    """Pure-JAX reference mirroring the PyTorch module."""
    B = coords.shape[0]
    x = coords.reshape(B, -1, coords.shape[-1])
    proj = 2.0 * np.pi * jnp.einsum("bnd,df->bnf", x, bpe,
                                    precision=jax.lax.Precision.HIGHEST)
    h = jnp.concatenate([jnp.sin(proj), jnp.cos(proj)], axis=-1)
    depth = len(wbs)
    for i, wb in enumerate(wbs):
        ones = jnp.ones(h.shape[:-1] + (1,), h.dtype)
        h = jnp.einsum("bnd,bdo->bno", jnp.concatenate([h, ones], axis=-1), wb,
                       precision=jax.lax.Precision.HIGHEST)
        if i < depth - 1:
            h = jax.nn.relu(h)
        else:
            h = h + out_bias
    return h.reshape(coords.shape[:-1] + (h.shape[-1],))


if __name__ == "__main__":
    # Small shapes consistent with the module.
    B, H, W = 2, 16, 16
    in_dim, pe_dim, hidden_dim, out_dim = 2, 32, 32, 4
    depth = 3
    pe_sigma = 10.0
    out_bias = 0.5

    key = jax.random.PRNGKey(0)
    k_coord, k_bpe, *k_wb = jax.random.split(key, 2 + depth)

    # Input coordinates (B, H, W, in_dim), e.g. (x, y) in [-1, 1].
    coords = jax.random.uniform(
        k_coord, (B, H, W, in_dim), dtype=jnp.float32, minval=-1.0, maxval=1.0
    )

    # LearnableFourierFeatures.B ~ randn * sigma
    bpe = pe_sigma * jax.random.normal(k_bpe, (in_dim, pe_dim // 2), dtype=jnp.float32)

    # Batched wb params: (B, last_dim + 1, cur_dim), last row = bias.
    wbs = []
    last_dim = pe_dim
    for i in range(depth):
        cur_dim = hidden_dim if i < depth - 1 else out_dim
        bound = 1.0 / math.sqrt(last_dim)
        wbs.append(
            jax.random.uniform(
                k_wb[i], (B, last_dim + 1, cur_dim),
                dtype=jnp.float32, minval=-bound, maxval=bound,
            )
        )
        last_dim = cur_dim

    # Main run.
    out = inr_mlp_forward(coords, bpe, wbs, out_bias=out_bias)
    out = jax.block_until_ready(out)
    ref = _reference_forward(coords, bpe, wbs, out_bias)
    assert out.shape == (B, H, W, out_dim)
    np.testing.assert_allclose(np.asarray(out), np.asarray(ref), rtol=2e-4, atol=2e-4)

    # Exercise the multi-tile + padded-tail path (N not a multiple of the tile).
    H2, W2 = 10, 13
    coords2 = jax.random.uniform(
        jax.random.PRNGKey(1), (B, H2, W2, in_dim),
        dtype=jnp.float32, minval=-1.0, maxval=1.0,
    )
    out2 = jax.block_until_ready(
        inr_mlp_forward(coords2, bpe, wbs, out_bias=out_bias, tile_n=128)
    )
    ref2 = _reference_forward(coords2, bpe, wbs, out_bias)
    assert out2.shape == (B, H2, W2, out_dim)
    np.testing.assert_allclose(np.asarray(out2), np.asarray(ref2), rtol=2e-4, atol=2e-4)

    print("KERNEL_OK")
</pallas_src>

<mosaic_0001>
module attributes {stable_mosaic.version = 11 : i64} {
  func.func @kernel(%arg0: i32, %arg1: i32, %arg2: memref<1x2x256xf32, #tpu.memory_space<vmem>>, %arg3: memref<16x2xf32, #tpu.memory_space<vmem>>, %arg4: memref<1x32x32xf32, #tpu.memory_space<vmem>>, %arg5: memref<1x32x1xf32, #tpu.memory_space<vmem>>, %arg6: memref<1x32x32xf32, #tpu.memory_space<vmem>>, %arg7: memref<1x32x1xf32, #tpu.memory_space<vmem>>, %arg8: memref<1x4x32xf32, #tpu.memory_space<vmem>>, %arg9: memref<1x4x1xf32, #tpu.memory_space<vmem>>, %arg10: memref<1x4x256xf32, #tpu.memory_space<vmem>>, %arg11: memref<32x256xf32, #tpu.memory_space<vmem>>) attributes {dimension_semantics = [#tpu.dimension_semantics<parallel>, #tpu.dimension_semantics<parallel>], iteration_bounds = array<i64: 2, 1>, scalar_prefetch = 0 : i64, scratch_operands = 1 : i64, tpu.core_type = #tpu.core_type<tc>, window_params = [{transform_indices = @transform_0, window_bounds = array<i64: 1, 2, 256>}, {pipeline_mode = #tpu.pipeline_mode<synchronous>, transform_indices = @transform_1, window_bounds = array<i64: 16, 2>}, {transform_indices = @transform_2, window_bounds = array<i64: 1, 32, 32>}, {transform_indices = @transform_3, window_bounds = array<i64: 1, 32, 1>}, {transform_indices = @transform_4, window_bounds = array<i64: 1, 32, 32>}, {transform_indices = @transform_5, window_bounds = array<i64: 1, 32, 1>}, {transform_indices = @transform_6, window_bounds = array<i64: 1, 4, 32>}, {transform_indices = @transform_7, window_bounds = array<i64: 1, 4, 1>}, {transform_indices = @transform_8, window_bounds = array<i64: 1, 4, 256>}]} {
    %c0 = arith.constant 0 : index
    %c0_0 = arith.constant 0 : index
    %c0_1 = arith.constant 0 : index
    %0 = vector.load %arg2[%c0, %c0_0, %c0_1] : memref<1x2x256xf32, #tpu.memory_space<vmem>>, vector<1x2x256xf32>
    %1 = vector.shape_cast %0 : vector<1x2x256xf32> to vector<2x256xf32>
    %c0_2 = arith.constant 0 : index
    %c0_3 = arith.constant 0 : index
    %2 = vector.load %arg3[%c0_2, %c0_3] : memref<16x2xf32, #tpu.memory_space<vmem>>, vector<16x2xf32>
    %3 = vector.extract_strided_slice %2 {offsets = [0, 0], sizes = [16, 1], strides = [1, 1]} : vector<16x2xf32> to vector<16x1xf32>
    %4 = vector.extract_strided_slice %1 {offsets = [0, 0], sizes = [1, 256], strides = [1, 1]} : vector<2x256xf32> to vector<1x256xf32>
    %5 = vector.broadcast %3 : vector<16x1xf32> to vector<16x256xf32>
    %6 = vector.broadcast %4 : vector<1x256xf32> to vector<16x256xf32>
    %7 = arith.mulf %5, %6 : vector<16x256xf32>
    %8 = vector.extract_strided_slice %2 {offsets = [0, 1], sizes = [16, 1], strides = [1, 1]} : vector<16x2xf32> to vector<16x1xf32>
    %9 = vector.extract_strided_slice %1 {offsets = [1, 0], sizes = [1, 256], strides = [1, 1]} : vector<2x256xf32> to vector<1x256xf32>
    %10 = vector.broadcast %8 : vector<16x1xf32> to vector<16x256xf32>
    %11 = vector.broadcast %9 : vector<1x256xf32> to vector<16x256xf32>
    %12 = arith.mulf %10, %11 : vector<16x256xf32>
    %13 = arith.addf %7, %12 : vector<16x256xf32>
    %14 = math.sin %13 : vector<16x256xf32>
    %c0_4 = arith.constant 0 : index
    %c0_5 = arith.constant 0 : index
    %15 = vector.load %arg11[%c0_4, %c0_5] : memref<32x256xf32, #tpu.memory_space<vmem>>, vector<16x256xf32>
    tpu.vector_store %arg11[%c0_4, %c0_5], %14 {strides = array<i32>} : memref<32x256xf32, #tpu.memory_space<vmem>>, vector<16x256xf32>,
    %16 = math.cos %13 : vector<16x256xf32>
    %c16 = arith.constant 16 : index
    %c0_6 = arith.constant 0 : index
    %17 = vector.load %arg11[%c16, %c0_6] : memref<32x256xf32, #tpu.memory_space<vmem>>, vector<16x256xf32>
    tpu.vector_store %arg11[%c16, %c0_6], %16 {strides = array<i32>} : memref<32x256xf32, #tpu.memory_space<vmem>>, vector<16x256xf32>,
    %c0_7 = arith.constant 0 : index
    %c0_8 = arith.constant 0 : index
    %c0_9 = arith.constant 0 : index
    %18 = vector.load %arg4[%c0_7, %c0_8, %c0_9] : memref<1x32x32xf32, #tpu.memory_space<vmem>>, vector<1x32x32xf32>
    %19 = vector.shape_cast %18 : vector<1x32x32xf32> to vector<32x32xf32>
    %c0_10 = arith.constant 0 : index
    %c0_11 = arith.constant 0 : index
    %c0_12 = arith.constant 0 : index
    %20 = vector.load %arg5[%c0_10, %c0_11, %c0_12] : memref<1x32x1xf32, #tpu.memory_space<vmem>>, vector<1x32x1xf32>
    %21 = vector.shape_cast %20 : vector<1x32x1xf32> to vector<32x1xf32>
    %c0_13 = arith.constant 0 : index
    %c0_14 = arith.constant 0 : index
    %22 = vector.load %arg11[%c0_13, %c0_14] : memref<32x256xf32, #tpu.memory_space<vmem>>, vector<32x256xf32>
    %cst = arith.constant dense<0.000000e+00> : vector<32x256xf32>
    %23 = tpu.matmul %19, %22, %cst {dimension_numbers = #tpu.dot_dimension_numbers<[1], [0], [0], [1], [0, 0, 1, 1], [], []>} : vector<32x32xf32>, vector<32x256xf32>, vector<32x256xf32> -> vector<32x256xf32>
    %24 = vector.broadcast %21 : vector<32x1xf32> to vector<32x256xf32>
    %25 = arith.addf %23, %24 : vector<32x256xf32>
    %cst_15 = arith.constant 0.000000e+00 : f32
    %26 = vector.broadcast %cst_15 : f32 to vector<32x256xf32>
    %27 = arith.maximumf %25, %26 : vector<32x256xf32>
    %c0_16 = arith.constant 0 : index
    %c0_17 = arith.constant 0 : index
    %c0_18 = arith.constant 0 : index
    %28 = vector.load %arg6[%c0_16, %c0_17, %c0_18] : memref<1x32x32xf32, #tpu.memory_space<vmem>>, vector<1x32x32xf32>
    %29 = vector.shape_cast %28 : vector<1x32x32xf32> to vector<32x32xf32>
    %c0_19 = arith.constant 0 : index
    %c0_20 = arith.constant 0 : index
    %c0_21 = arith.constant 0 : index
    %30 = vector.load %arg7[%c0_19, %c0_20, %c0_21] : memref<1x32x1xf32, #tpu.memory_space<vmem>>, vector<1x32x1xf32>
    %31 = vector.shape_cast %30 : vector<1x32x1xf32> to vector<32x1xf32>
    %cst_22 = arith.constant dense<0.000000e+00> : vector<32x256xf32>
    %32 = tpu.matmul %29, %27, %cst_22 {dimension_numbers = #tpu.dot_dimension_numbers<[1], [0], [0], [1], [0, 0, 1, 1], [], []>} : vector<32x32xf32>, vector<32x256xf32>, vector<32x256xf32> -> vector<32x256xf32>
    %33 = vector.broadcast %31 : vector<32x1xf32> to vector<32x256xf32>
    %34 = arith.addf %32, %33 : vector<32x256xf32>
    %cst_23 = arith.constant 0.000000e+00 : f32
    %35 = vector.broadcast %cst_23 : f32 to vector<32x256xf32>
    %36 = arith.maximumf %34, %35 : vector<32x256xf32>
    %c0_24 = arith.constant 0 : index
    %c0_25 = arith.constant 0 : index
    %c0_26 = arith.constant 0 : index
    %37 = vector.load %arg8[%c0_24, %c0_25, %c0_26] : memref<1x4x32xf32, #tpu.memory_space<vmem>>, vector<1x4x32xf32>
    %38 = vector.shape_cast %37 : vector<1x4x32xf32> to vector<4x32xf32>
    %c0_27 = arith.constant 0 : index
    %c0_28 = arith.constant 0 : index
    %c0_29 = arith.constant 0 : index
    %39 = vector.load %arg9[%c0_27, %c0_28, %c0_29] : memref<1x4x1xf32, #tpu.memory_space<vmem>>, vector<1x4x1xf32>
    %40 = vector.shape_cast %39 : vector<1x4x1xf32> to vector<4x1xf32>
    %cst_30 = arith.constant dense<0.000000e+00> : vector<4x256xf32>
    %41 = tpu.matmul %38, %36, %cst_30 {dimension_numbers = #tpu.dot_dimension_numbers<[1], [0], [0], [1], [0, 0, 1, 1], [], []>} : vector<4x32xf32>, vector<32x256xf32>, vector<4x256xf32> -> vector<4x256xf32>
    %42 = vector.broadcast %40 : vector<4x1xf32> to vector<4x256xf32>
    %43 = arith.addf %41, %42 : vector<4x256xf32>
    %c0_31 = arith.constant 0 : index
    %c0_32 = arith.constant 0 : index
    %c0_33 = arith.constant 0 : index
    %44 = vector.load %arg10[%c0_31, %c0_32, %c0_33] : memref<1x4x256xf32, #tpu.memory_space<vmem>>, vector<1x4x256xf32>
    %45 = vector.shape_cast %44 : vector<1x4x256xf32> to vector<4x256xf32>
    %46 = vector.shape_cast %43 : vector<4x256xf32> to vector<1x4x256xf32>
    tpu.vector_store %arg10[%c0_31, %c0_32, %c0_33], %46 {strides = array<i32>} : memref<1x4x256xf32, #tpu.memory_space<vmem>>, vector<1x4x256xf32>,
    return
  }
  func.func @transform_0(%arg0: i32, %arg1: i32) -> (i32, i32, i32) {
    %c0_i32 = arith.constant 0 : i32
    %c0_i32_0 = arith.constant 0 : i32
    return %arg0, %c0_i32, %arg1 : i32, i32, i32
  }
  func.func @transform_1(%arg0: i32, %arg1: i32) -> (i32, i32) {
    %c0_i32 = arith.constant 0 : i32
    %c0_i32_0 = arith.constant 0 : i32
    %c0_i32_1 = arith.constant 0 : i32
    return %c0_i32, %c0_i32_0 : i32, i32
  }
  func.func @transform_2(%arg0: i32, %arg1: i32) -> (i32, i32, i32) {
    %c0_i32 = arith.constant 0 : i32
    %c0_i32_0 = arith.constant 0 : i32
    %c0_i32_1 = arith.constant 0 : i32
    return %arg0, %c0_i32, %c0_i32_0 : i32, i32, i32
  }
  func.func @transform_3(%arg0: i32, %arg1: i32) -> (i32, i32, i32) {
    %c0_i32 = arith.constant 0 : i32
    %c0_i32_0 = arith.constant 0 : i32
    %c0_i32_1 = arith.constant 0 : i32
    return %arg0, %c0_i32, %c0_i32_0 : i32, i32, i32
  }
  func.func @transform_4(%arg0: i32, %arg1: i32) -> (i32, i32, i32) {
    %c0_i32 = arith.constant 0 : i32
    %c0_i32_0 = arith.constant 0 : i32
    %c0_i32_1 = arith.constant 0 : i32
    return %arg0, %c0_i32, %c0_i32_0 : i32, i32, i32
  }
  func.func @transform_5(%arg0: i32, %arg1: i32) -> (i32, i32, i32) {
    %c0_i32 = arith.constant 0 : i32
    %c0_i32_0 = arith.constant 0 : i32
    %c0_i32_1 = arith.constant 0 : i32
    return %arg0, %c0_i32, %c0_i32_0 : i32, i32, i32
  }
  func.func @transform_6(%arg0: i32, %arg1: i32) -> (i32, i32, i32) {
    %c0_i32 = arith.constant 0 : i32
    %c0_i32_0 = arith.constant 0 : i32
    %c0_i32_1 = arith.constant 0 : i32
    return %arg0, %c0_i32, %c0_i32_0 : i32, i32, i32
  }
  func.func @transform_7(%arg0: i32, %arg1: i32) -> (i32, i32, i32) {
    %c0_i32 = arith.constant 0 : i32
    %c0_i32_0 = arith.constant 0 : i32
    %c0_i32_1 = arith.constant 0 : i32
    return %arg0, %c0_i32, %c0_i32_0 : i32, i32, i32
  }
  func.func @transform_8(%arg0: i32, %arg1: i32) -> (i32, i32, i32) {
    %c0_i32 = arith.constant 0 : i32
    %c0_i32_0 = arith.constant 0 : i32
    return %arg0, %c0_i32, %arg1 : i32, i32, i32
  }
}

</mosaic_0001>

<bundles_post_ra>
// kernel: tpu_custom_call.1
= control target key start
LH: loop header
LB: loop body
LE: loop exit
PB: predicated region body
PF: predicated region fallthrough
CT: control target
= control target key end

     0   :  { %13 = vsyncpa [#allocation4], 0  ;;  %s3134_s0 = inlined_call_operand.vmem [shape: f32[2,2,256], index: 0, kind: input, shape index: {}]   ;;  %s3135_s1 = inlined_call_operand.vmem [shape: f32[16,2], index: 1, kind: input, shape index: {}]   ;;  %s3136_s2 = inlined_call_operand.vmem [shape: f32[2,32,32], index: 2, kind: input, shape index: {}]   ;;  %s3137_s3 = inlined_call_operand.vmem [shape: f32[2,32,1], index: 3, kind: input, shape index: {}]   ;;  %s3138_s4 = inlined_call_operand.vmem [shape: f32[2,32,32], index: 4, kind: input, shape index: {}]   ;;  %s3139_s5 = inlined_call_operand.vmem [shape: f32[2,32,1], index: 5, kind: input, shape index: {}]   ;;  %s3140_s6 = inlined_call_operand.vmem [shape: f32[2,4,32], index: 6, kind: input, shape index: {}]   ;;  %s3141_s7 = inlined_call_operand.vmem [shape: f32[2,4,1], index: 7, kind: input, shape index: {}]   ;;  %s3142_s8 = inlined_call_operand.hbm [shape: f32[2,4,256], index: 8, kind: output, shape index: {}]  }
   0x1   :  { %15 = vsyncpa [#allocation4 + $0x1], 0  ;;  %s2458_s27 = smov 0   ;;  %s2460_s28 = smov 0  }
   0x2   :  { %s2462_s29 = smov 0   ;;  %s2464_s30 = smov 0  }
   0x3   :  { %s2466_s9 = smov 0   ;;  %s2468_s10 = smov 0  }
   0x4 LB: > { %s2184_s11 = sadd.s32 4294967295, %s2403_s10   ;;  %s2185_s12 = sadd.s32 4294967294, %s2403_s10   ;;  %s2403_s10 = sphi %s2468_s10, %s21_s10   ;;  %s2399_s9 = sphi %s2466_s9, %s3155_s9   ;;  %s2395_s30 = sphi %s2464_s30, %s3154_s30   ;;  %s2391_s29 = sphi %s2462_s29, %s3153_s29   ;;  %s2387_s28 = sphi %s2460_s28, %s3152_s28   ;;  %s2383_s27 = sphi %s2458_s27, %s3151_s27  }
   0x5   : > { %s33_s13 = sadd.s32 1, %s2399_s9  ;;  %s247_s14 = sadd.s32 1, %s2391_s29 }
   0x6   : > { %p35_p0 = scmp.ge.s32.totalorder %s33_s13, 2  ;;  %p257_p1 = scmp.ne.s32.totalorder %s2391_s29, %s2387_s28 }
   0x7   : > { %p258_p2 = scmp.eq.s32.totalorder %s2184_s11, 1  ;;  %p263_p3 = scmp.ne.s32.totalorder %s2387_s28, %s2383_s27 }
   0x8   : > { %s3157_s13 = smov (%p35_p0, %s33_s13), 0  ;;  %p264_p5 = scmp.eq.s32.totalorder %s2185_s12, 1 }
   0x9   : > { %p2498_p4 = por %p258_p2, %p257_p1  ;;  %s242_s16 = ssub.s32 %s2399_s9, %s3157_s13 }
   0xa   : > { %p2188_p6 = scmp.ge.s32.totalorder %s2403_s10, 1  ;;  %p245_p7 = scmp.eq.s32.totalorder %s242_s16, 0 }
   0xb   : > { %p2505_p8 = por %p264_p5, %p263_p3  ;;  %p344_p9 = scmp.lt.s32.totalorder %s2403_s10, 3 }
   0xc   : > { %s2511_s18 = scalar_select %p245_p7, %s2391_s29, %s247_s14  }
   0xd   : > { %p345_p10 = pnand %p2188_p6, %p344_p9 }
   0xe   : > { %p411_p11 = scmp.lt.s32.totalorder (!%p345_p10), %s2395_s30, 1 }
   0xf   : > { %348 = sbr.rel (%p345_p10) target bundleno = 806 (0x326), region = 52 }
  0x14   : > { %v451_v0 = vld [vmem:[%s3135_s1 + $0x8] sm:$0xff]  ;;  %v450_v1 = vld [vmem:[%s3135_s1] sm:$0xff]  ;;  %v2405_v2 = vmov 0   ;;  %v2406_v3 = vmov 1   ;;  %s2526_s23 = scalar_select %p411_p11, %s2395_s30, 1 }
  0x15   : > { %2320 = vset.pattern.permute.xlu1 %v2405_v2  ;;  %2318 = vset.pattern.permute.xlu0 %v2405_v2  ;;  %v2407_v57 = vmov 683565275   ;;  %v2408_v59 = vmov 2475754826   ;;  %v2409_v62 = vmov 2131351028  }
  0x16   : > { %459 = vperm.xlu0 %2318, %v451_v0   ;;  %454 = vperm.xlu1 %2320, %v450_v1   ;;  %s2529_s24 = sshll.u32 %s2526_s23, 2  ;;  %s3001_s12 = sshll.u32 %s2526_s23, 5 }
  0x17   : > { %2322 = vset.pattern.permute.xlu2 %v2405_v2  ;;  %s418_s11 = scalar_lea.vmem %s3134_s0, %s2529_s24  ;;  %s3020_s19 = scalar_lea.vmem %s3136_s2, %s3001_s12 }
  0x18   : > { %v449_v4 = vld [vmem:[%s418_s11] sm:$0xf]  ;;  %s3048_s22 = scalar_lea.vmem %s3137_s3, %s3001_s12  ;;  %s3058_s26 = scalar_lea.vmem %s3139_s5, %s3001_s12 }
  0x19   : > { %v463_v7 = vperm.slane %v449_v4, 0  ;;  %v464_v8 = vperm.slane %v449_v4, 2  ;;  %v481_v9 = vperm.slane %v449_v4, 1  ;;  %v482_v10 = vperm.slane %v449_v4, 3  ;;  %s447_s16 = scalar_lea.vmem %s3141_s7, %s2529_s24  ;;  %s434_s21 = scalar_lea.vmem %s3138_s4, %s3001_s12 }
  0x1a   : > { %s443_s23 = scalar_lea.vmem %s3140_s6, %s2529_s24  ;;  %s407_s24 = sand.u32 1, %s2387_s28  }
  0x1b   : > { %v467_v11 = vperm.slane %v463_v7, 0  ;;  %v468_v12 = vperm.slane %v464_v8, 0  ;;  %v485_v13 = vperm.slane %v481_v9, 1  ;;  %v486_v14 = vperm.slane %v482_v10, 1  ;;  %s2189_s25 = sshll.u32 %s407_s24, 3 }
  0x1c   : > { %v2412_v8 = vmov 1326507024  }
  0x1e   : > { %2319 = vset.pattern.permute.xlu0 %v2406_v3  ;;  %2321 = vset.pattern.permute.xlu1 %v2406_v3 }
  0x1f   : > { %478 = vperm.xlu0 %2319, %v451_v0   ;;  %474 = vperm.xlu1 %2321, %v450_v1   ;;  %v2410_v1 = vmov 2102212464  }
  0x27   : > { %2323 = vset.pattern.permute.xlu1 %v2405_v2  ;;  %2324 = vset.pattern.permute.xlu0 %v2405_v2 }
  0x88   : > { %v460_v5 = vpop.permute.xlu0 %459  ;;  %v455_v6 = vpop.permute.xlu1 %454 }
  0x89   : > { %v471_v15 = vmul.f32 %v467_v11, %v460_v5  ;;  %v472_v16 = vmul.f32 %v468_v12, %v460_v5  ;;  %v469_v17 = vmul.f32 %v467_v11, %v455_v6  ;;  %v470_v18 = vmul.f32 %v468_v12, %v455_v6 }
  0x8a   : > { %v2411_v5 = vmov 920167782  }
  0x91   : > { %v479_v19 = vpop.permute.xlu0 %478  ;;  %v475_v20 = vpop.permute.xlu1 %474 }
  0x92   : > { %v489_v21 = vmul.f32 %v485_v13, %v479_v19  ;;  %v490_v22 = vmul.f32 %v486_v14, %v479_v19  ;;  %v487_v23 = vmul.f32 %v485_v13, %v475_v20  ;;  %v488_v24 = vmul.f32 %v486_v14, %v475_v20 }
  0x94   : > { %v2535_v25 = vadd.f32 %v489_v21, %v471_v15  ;;  %v2537_v26 = vadd.f32 %v490_v22, %v472_v16  ;;  %v2539_v27 = vadd.f32 %v487_v23, %v469_v17  ;;  %v2541_v28 = vadd.f32 %v488_v24, %v470_v18 }
  0x96   : > { %v808_v29 = vand.u32 2139095040, %v2535_v25  ;;  %v963_v30 = vand.u32 2139095040, %v2537_v26  ;;  %v498_v31 = vand.u32 2139095040, %v2539_v27  ;;  %v653_v32 = vand.u32 2139095040, %v2541_v28 }
  0x97   : > { %v805_v33 = vand.u32 2147483647, %v2535_v25  ;;  %v960_v44 = vand.u32 2147483647, %v2537_v26 }
  0x98   : > { %v809_v34 = vshrl.u32 %v808_v29, 23  ;;  %v964_v35 = vshrl.u32 %v963_v30, 23  ;;  %v499_v36 = vshrl.u32 %v498_v31, 23  ;;  %v654_v39 = vshrl.u32 %v653_v32, 23 }
  0x99   : > { %v812_v40 = vand.u32 8388607, %v805_v33  ;;  %v2553_v50 = vand.u32 8388607, %v960_v44 }
  0x9a   : > { %v2208_v37 = vadd.s32 4294967169, %v809_v34  ;;  %v2211_v38 = vadd.s32 4294967169, %v964_v35  ;;  %v2202_v43 = vadd.s32 4294967169, %v499_v36  ;;  %v2205_v45 = vadd.s32 4294967169, %v654_v39 }
  0x9b   : > { %v813_v46 = vor.u32 8388608, %v812_v40  ;;  %v968_v13 = vor.u32 8388608, %v2553_v50 }
  0x9c   : > { %v815_v41 = vadd.s32 1, %v2208_v37  ;;  %v970_v42 = vadd.s32 1, %v2211_v38  ;;  %v505_v52 = vadd.s32 1, %v2202_v43  ;;  %v2555_v53 = vadd.s32 1, %v2205_v45 }
  0x9d   : > { %v2557_v54 = vshll.u32 %v813_v46, 8 }
  0x9e   : > { %vm816_vm0 = vcmp.gt.s32.totalorder %v815_v41, 0  ;;  %vm971_vm1 = vcmp.gt.s32.totalorder %v970_v42, 0  ;;  %vm506_vm2 = vcmp.gt.s32.totalorder %v505_v52, 0  ;;  %vm661_vm11 = vcmp.gt.s32.totalorder %v2555_v53, 0 }
  0x9f   : > { %v817_v47 = vsel %vm816_vm0, %v815_v41, 0  ;;  %v972_v49 = vsel %vm971_vm1, %v970_v42, 0  ;;  %v854_v31 = vand.u32 65535, %v2557_v54  ;;  %v855_v32 = vshrl.u32 %v2557_v54, 16 }
  0xa0   : > { %v819_v48 = vand.u32 31, %v817_v47  ;;  %v2559_v55 = vshrl.u32 %v817_v47, 5  ;;  %v2561_v56 = vand.u32 31, %v972_v49  ;;  %v2596_v38 = vshrl.u32 %v972_v49, 5 }
  0xa1   : > { %v2599_v39 = vsel %vm506_vm2, %v505_v52, 0  ;;  %vm807_vm1 = vcmp.lt.s32.totalorder %v2535_v25, 0 }
  0xa2   : > { %v820_v51 = vsub.s32 32, %v819_v48  ;;  %v822_v58 = vshll.u32 %v2407_v57, %v819_v48  ;;  %v825_v60 = vshll.u32 %v2408_v59, %v819_v48  ;;  %v828_v0 = vshll.u32 %v2409_v62, %v819_v48 }
  0xa3   : > { %v831_v4 = vshll.u32 %v2410_v1, %v819_v48  ;;  %v834_v7 = vshll.u32 %v2411_v5, %v819_v48  ;;  %vm837_vm3 = vcmp.lt.s32.totalorder %v2559_v55, 1  ;;  %v2576_v16 = vsub.s32 32, %v2561_v56 }
  0xa4   : > { %v823_v61 = vshrl.u32 %v2408_v59, %v820_v51  ;;  %v826_v63 = vshrl.u32 %v2409_v62, %v820_v51  ;;  %v829_v3 = vshrl.u32 %v2410_v1, %v820_v51  ;;  %v832_v6 = vshrl.u32 %v2411_v5, %v820_v51 }
  0xa5   : > { %v835_v9 = vshrl.u32 %v2412_v8, %v820_v51  ;;  %vm840_vm4 = vcmp.lt.s32.totalorder %v2559_v55, 4  ;;  %v821_v19 = vshrl.u32 %v2407_v57, %v820_v51  ;;  %vm839_vm5 = vcmp.lt.s32.totalorder %v2559_v55, 3 }
  0xa6   : > { %v824_v10 = vor.u32 %v823_v61, %v822_v58  ;;  %v827_v11 = vor.u32 %v826_v63, %v825_v60  ;;  %v830_v12 = vor.u32 %v829_v3, %v828_v0  ;;  %v833_v14 = vor.u32 %v832_v6, %v831_v4 }
  0xa7   : > { %v836_v15 = vor.u32 %v835_v9, %v834_v7  ;;  %vm838_vm6 = vcmp.lt.s32.totalorder %v2559_v55, 2  ;;  %v977_v45 = vshll.u32 %v2407_v57, %v2561_v56  ;;  %v978_v46 = vshrl.u32 %v2408_v59, %v2576_v16 }
  0xa8   : > { %v845_v17 = vsel %vm837_vm3, %v824_v10, %v827_v11  ;;  %v849_v18 = vsel %vm837_vm3, %v827_v11, %v830_v12  ;;  %v846_v20 = vsel %vm840_vm4, %v833_v14, 920167782  ;;  %v842_v22 = vsel %vm840_vm4, %v830_v12, 2102212464 }
  0xa9   : > { %v850_v21 = vsel %vm840_vm4, %v836_v15, 1326507024  ;;  %v847_v23 = vsel %vm839_vm5, %v830_v12, %v846_v20  ;;  %v841_v40 = vsel %vm837_vm3, %v821_v19, %v824_v10  ;;  %v843_v41 = vsel %vm839_vm5, %v827_v11, %v842_v22 }
  0xaa   : > { %v851_v24 = vsel %vm839_vm5, %v833_v14, %v850_v21  ;;  %v848_v29 = vsel %vm838_vm6, %v845_v17, %v847_v23  ;;  %v980_v49 = vshll.u32 %v2408_v59, %v2561_v56  ;;  %v981_v51 = vshrl.u32 %v2409_v62, %v2576_v16 }
  0xab   : > { %v852_v30 = vsel %vm838_vm6, %v849_v18, %v851_v24  ;;  %v878_v36 = vand.u32 65535, %v848_v29  ;;  %v879_v37 = vshrl.u32 %v848_v29, 16  ;;  %v2614_v12 = vor.u32 %v978_v46, %v977_v45 }
  0xac   : > { %v856_v34 = vand.u32 65535, %v852_v30  ;;  %v857_v35 = vshrl.u32 %v852_v30, 16  ;;  %v984_v17 = vshrl.u32 %v2410_v1, %v2576_v16  ;;  %v2620_v20 = vor.u32 %v981_v51, %v980_v49 }
  0xad   : > { %v881_v47 = vmul.u32 %v879_v37, %v854_v31  ;;  %v882_v48 = vmul.u32 %v878_v36, %v855_v32  ;;  %v880_v61 = vmul.u32 %v878_v36, %v854_v31  ;;  %v883_v3 = vmul.u32 %v879_v37, %v855_v32 }
  0xae   : > { %v859_v42 = vmul.u32 %v857_v35, %v854_v31  ;;  %v860_v43 = vmul.u32 %v856_v34, %v855_v32  ;;  %v858_v52 = vmul.u32 %v856_v34, %v854_v31  ;;  %v861_v58 = vmul.u32 %v857_v35, %v855_v32 }
  0xaf   : > { %v884_v4 = vshll.u32 %v881_v47, 16  ;;  %v885_v7 = vshrl.u32 %v881_v47, 16  ;;  %v886_v9 = vshll.u32 %v882_v48, 16  ;;  %v983_v23 = vshll.u32 %v2409_v62, %v2561_v56 }
  0xb0   : > { %v862_v60 = vshll.u32 %v859_v42, 16  ;;  %v863_v63 = vshrl.u32 %v859_v42, 16  ;;  %v864_v0 = vshll.u32 %v860_v43, 16  ;;  %v986_v24 = vshll.u32 %v2410_v1, %v2561_v56 }
  0xb1   : > { %vm888_vm8 = vc.u32 %v880_v61, %v884_v4  ;;  %v890_v11 = vadd.s32 %v884_v4, %v880_v61  ;;  %v987_v30 = vshrl.u32 %v2411_v5, %v2576_v16  ;;  %v989_v31 = vshll.u32 %v2411_v5, %v2561_v56 }
  0xb2   : > { %vm866_vm7 = vc.u32 %v858_v52, %v862_v60  ;;  %v868_v6 = vadd.s32 %v862_v60, %v858_v52  ;;  %v889_v15 = vsel %vm888_vm8, 1, %v2405_v2  ;;  %v990_v32 = vshrl.u32 %v2412_v8, %v2576_v16 }
  0xb3   : > { %v867_v10 = vsel %vm866_vm7, 1, %v2405_v2  ;;  %v891_v19 = vadd.s32 %v889_v15, %v883_v3  ;;  %vm892_vm10 = vc.u32 %v890_v11, %v886_v9  ;;  %v865_v34 = vshrl.u32 %v860_v43, 16 }
  0xb4   : > { %v869_v14 = vadd.s32 %v867_v10, %v861_v58  ;;  %vm870_vm9 = vc.u32 %v868_v6, %v864_v0  ;;  %v893_v22 = vsel %vm892_vm10, 1, %v2405_v2  ;;  %v887_v36 = vshrl.u32 %v882_v48, 16 }
  0xb5   : > { %v871_v18 = vsel %vm870_vm9, 1, %v2405_v2  ;;  %v895_v29 = vadd.s32 %v893_v22, %v891_v19  ;;  %v985_v37 = vor.u32 %v984_v17, %v983_v23  ;;  %v988_v45 = vor.u32 %v987_v30, %v986_v24 }
  0xb6   : > { %v873_v21 = vadd.s32 %v871_v18, %v869_v14  ;;  %v991_v46 = vor.u32 %v990_v32, %v989_v31  ;;  %vm992_vm12 = vcmp.lt.s32.totalorder %v2596_v38, 1  ;;  %v2637_v49 = vadd.s32 %v890_v11, %v886_v9 }
  0xb7   : > { %v896_v42 = vadd.s32 %v895_v29, %v885_v7  ;;  %vm995_vm13 = vcmp.lt.s32.totalorder %v2596_v38, 4  ;;  %v1000_v56 = vsel %vm992_vm12, %v2614_v12, %v2620_v20  ;;  %v844_v43 = vsel %vm838_vm6, %v841_v40, %v843_v41 }
  0xb8   : > { %v874_v35 = vadd.s32 %v873_v21, %v863_v63  ;;  %vm994_vm14 = vcmp.lt.s32.totalorder %v2596_v38, 3  ;;  %v1001_v51 = vsel %vm995_vm13, %v988_v45, 920167782  ;;  %vm993_vm0 = vcmp.lt.s32.totalorder %v2596_v38, 2 }
  0xb9   : > { %v897_v48 = vadd.s32 %v896_v42, %v887_v36  ;;  %v1002_v52 = vsel %vm994_vm14, %v985_v37, %v1001_v51  ;;  %v1004_v58 = vsel %vm992_vm12, %v2620_v20, %v985_v37  ;;  %v1005_v41 = vsel %vm995_vm13, %v991_v46, 1326507024 }
  0xba   : > { %v2635_v47 = vadd.s32 %v874_v35, %v865_v34  ;;  %v1003_v40 = vsel %vm993_vm0, %v1000_v56, %v1002_v52  ;;  %v2663_v60 = vshll.u32 %v968_v13, 8  ;;  %v898_v61 = vmul.u32 %v2557_v54, %v844_v43 }
  0xbb   : > { %v901_v55 = vadd.s32 1, %v897_v48  ;;  %v1006_v63 = vsel %vm994_vm14, %v988_v45, %v1005_v41  ;;  %v1033_v0 = vand.u32 65535, %v1003_v40  ;;  %v1034_v3 = vshrl.u32 %v1003_v40, 16 }
  0xbc   : > { %vm900_vm15 = vc.u32 %v2635_v47, %v2637_v49  ;;  %v1007_v6 = vsel %vm993_vm0, %v1004_v58, %v1006_v63  ;;  %v1009_v7 = vand.u32 65535, %v2663_v60  ;;  %v1010_v9 = vshrl.u32 %v2663_v60, 16 }
  0xbd   : > { %v902_v4 = vsel %vm900_vm15, %v901_v55, %v897_v48  ;;  %v1011_v11 = vand.u32 65535, %v1007_v6  ;;  %v1012_v50 = vshrl.u32 %v1007_v6, 16  ;;  %v495_v13 = vand.u32 2147483647, %v2539_v27 }
  0xbe   : > { %v903_v10 = vadd.s32 %v902_v4, %v898_v61  ;;  %v2676_v54 = vsel %vm661_vm11, %v2555_v53, 0  ;;  %v976_v14 = vshrl.u32 %v2407_v57, %v2576_v16  ;;  %v1036_v15 = vmul.u32 %v1034_v3, %v1009_v7 }
  0xbf   : > { %v1037_v17 = vmul.u32 %v1033_v0, %v1010_v9  ;;  %v2681_v18 = vshrl.u32 %v2599_v39, 5  ;;  %v1014_v21 = vmul.u32 %v1012_v50, %v1009_v7  ;;  %v1015_v22 = vmul.u32 %v1011_v11, %v1010_v9 }
  0xc0   : > { %v904_v19 = vadd.s32 536870912, %v903_v10  ;;  %v2684_v23 = vand.u32 31, %v2599_v39  ;;  %v996_v24 = vsel %vm992_vm12, %v976_v14, %v2614_v12  ;;  %v1035_v53 = vmul.u32 %v1033_v0, %v1009_v7 }
  0xc1   : > { %v1039_v29 = vshll.u32 %v1036_v15, 16  ;;  %v997_v16 = vsel %vm995_vm13, %v985_v37, 2102212464  ;;  %v1013_v31 = vmul.u32 %v1011_v11, %v1009_v7  ;;  %v1017_v32 = vshll.u32 %v1014_v21, 16 }
  0xc2   : > { %v905_v30 = vshrl.u32 %v904_v19, 30  ;;  %v1016_v34 = vmul.u32 %v1012_v50, %v1010_v9  ;;  %v1041_v35 = vshll.u32 %v1037_v17, 16  ;;  %v1019_v42 = vshll.u32 %v1015_v22, 16 }
  0xc3   : > { %vm1043_vm2 = vc.u32 %v1035_v53, %v1039_v29  ;;  %v1045_v36 = vadd.s32 %v1039_v29, %v1035_v53  ;;  %vm1021_vm3 = vc.u32 %v1013_v31, %v1017_v32  ;;  %v1023_v45 = vadd.s32 %v1017_v32, %v1013_v31 }
  0xc4   : > { %v906_v39 = vshll.u32 %v905_v30, 30  ;;  %v1022_v12 = vsel %vm1021_vm3, 1, %v2405_v2  ;;  %v1038_v46 = vmul.u32 %v1034_v3, %v1010_v9  ;;  %v1044_v56 = vsel %vm1043_vm2, 1, %v2405_v2 }
  0xc5   : > { %vm1047_vm4 = vc.u32 %v1045_v36, %v1041_v35  ;;  %v998_v37 = vsel %vm994_vm14, %v2620_v20, %v997_v16  ;;  %v1024_v48 = vadd.s32 %v1022_v12, %v1016_v34  ;;  %vm1025_vm5 = vc.u32 %v1023_v45, %v1019_v42 }
  0xc6   : > { %v907_v43 = vsub.s32 %v903_v10, %v906_v39  ;;  %v2698_v51 = vsub.s32 32, %v2684_v23  ;;  %v1026_v52 = vsel %vm1025_vm5, 1, %v2405_v2  ;;  %v1046_v58 = vadd.s32 %v1044_v56, %v1038_v46 }
  0xc7   : > { %v1048_v55 = vsel %vm1047_vm4, 1, %v2405_v2  ;;  %v929_v41 = vsub.s32 4, %v905_v30  ;;  %v1028_v61 = vadd.s32 %v1026_v52, %v1024_v48  ;;  %v999_v63 = vsel %vm993_vm0, %v996_v24, %v998_v37 }
  0xc8   : > { %vm908_vm6 = vcmp.lt.s32.totalorder %v907_v43, 0  ;;  %v909_v40 = vsub.s32 0, %v907_v43  ;;  %v1018_v0 = vshrl.u32 %v1014_v21, 16  ;;  %v1040_v3 = vshrl.u32 %v1036_v15, 16 }
  0xc9   : > { %v1050_v20 = vadd.s32 %v1048_v55, %v1046_v58  ;;  %v899_v4 = vadd.s32 %v2637_v49, %v2635_v47  ;;  %v1020_v7 = vshrl.u32 %v1015_v22, 16  ;;  %v502_v9 = vand.u32 8388607, %v495_v13 }
  0xca   : > { %v910_v6 = vsel %vm908_vm6, %v909_v40, %v907_v43  ;;  %v1029_v11 = vadd.s32 %v1028_v61, %v1018_v0  ;;  %v1042_v50 = vshrl.u32 %v1037_v17, 16  ;;  %v930_v19 = vsel %vm807_vm1, %v929_v41, %v905_v30 }
  0xcb   : > { %v911_v10 = vclz %v910_v6  ;;  %v1051_v14 = vadd.s32 %v1050_v20, %v1040_v3  ;;  %v2710_v38 = vadd.s32 %v1045_v36, %v1041_v35  ;;  %v1053_v15 = vmul.u32 %v2663_v60, %v999_v63 }
  0xcc   : > { %v512_v21 = vshll.u32 %v2407_v57, %v2684_v23  ;;  %vm2717_vm7 = vcmp.le.f32.partialorder %v805_v33, 0.7853982  ;;  %v2721_v22 = vadd.s32 %v1029_v11, %v1020_v7  ;;  %v513_v24 = vshrl.u32 %v2408_v59, %v2698_v51 }
  0xcd   : > { %v2209_v49 = vadd.s32 4294967294, %v911_v10  ;;  %v1052_v17 = vadd.s32 %v1051_v14, %v1042_v50  ;;  %v516_v53 = vshrl.u32 %v2409_v62, %v2698_v51  ;;  %v519_v60 = vshrl.u32 %v2410_v1, %v2698_v51 }
  0xce   : > { %v521_v29 = vshll.u32 %v2410_v1, %v2684_v23  ;;  %v522_v33 = vshrl.u32 %v2411_v5, %v2698_v51  ;;  %vm1055_vm9 = vc.u32 %v2721_v22, %v2710_v38  ;;  %v515_v16 = vshll.u32 %v2408_v59, %v2684_v23 }
  0xcf   : > { %vm2210_vm8 = vcmp.lt.s32.totalorder %v2209_v49, 0  ;;  %v1056_v30 = vadd.s32 1, %v1052_v17  ;;  %v518_v32 = vshll.u32 %v2409_v62, %v2684_v23  ;;  %v525_v35 = vshrl.u32 %v2412_v8, %v2698_v51 }
  0xd0   : > { %v914_v31 = vsel %vm2210_vm8, 0, %v2209_v49  ;;  %v523_v34 = vor.u32 %v522_v33, %v521_v29  ;;  %v524_v45 = vshll.u32 %v2411_v5, %v2684_v23  ;;  %v514_v46 = vor.u32 %v513_v24, %v512_v21 }
  0xd1   : > { %v915_v36 = vsub.s32 32, %v914_v31  ;;  %v919_v39 = vsub.s32 4294967266, %v914_v31  ;;  %v1057_v42 = vsel %vm1055_vm9, %v1056_v30, %v1052_v17  ;;  %v517_v56 = vor.u32 %v516_v53, %v515_v16 }
  0xd2   : > { %v1058_v12 = vadd.s32 %v1057_v42, %v1053_v15  ;;  %v520_v37 = vor.u32 %v519_v60, %v518_v32  ;;  %v916_v48 = vshll.u32 %v907_v43, %v914_v31  ;;  %v526_v55 = vor.u32 %v525_v35, %v524_v45 }
  0xd3   : > { %v917_v52 = vshrl.u32 %v899_v4, %v915_v36  ;;  %v920_v58 = vadd.s32 127, %v919_v39  ;;  %v2744_v40 = vand.u32 31, %v2676_v54  ;;  %v503_v61 = vor.u32 8388608, %v502_v9 }
  0xd4   : > { %v1059_v41 = vadd.s32 536870912, %v1058_v12  ;;  %vm530_vm10 = vcmp.lt.s32.totalorder %v2681_v18, 4  ;;  %vm527_vm11 = vcmp.lt.s32.totalorder %v2681_v18, 1  ;;  %v2752_v43 = vsel %vm2717_vm7, 0, %v930_v19 }
  0xd5   : > { %v918_v63 = vor.u32 %v917_v52, %v916_v48  ;;  %v921_v0 = vshll.u32 %v920_v58, 23  ;;  %v536_v23 = vsel %vm530_vm10, %v523_v34, 920167782  ;;  %vm529_vm12 = vcmp.lt.s32.totalorder %v2681_v18, 3 }
  0xd6   : > { %v2754_v3 = vshrl.u32 %v1059_v41, 30  ;;  %v539_v20 = vsel %vm527_vm11, %v517_v56, %v520_v37  ;;  %v535_v6 = vsel %vm527_vm11, %v514_v46, %v517_v56  ;;  %v537_v7 = vsel %vm529_vm12, %v520_v37, %v536_v23 }
  0xd7   : > { %v922_v4 = vor.u32 4788187, %v921_v0  ;;  %v540_v9 = vsel %vm530_vm10, %v526_v55, 1326507024  ;;  %vm528_vm13 = vcmp.lt.s32.totalorder %v2681_v18, 2  ;;  %v2769_v50 = vshll.u32 %v503_v61, 8 }
  0xd8   : > { %v1061_v10 = vshll.u32 %v2754_v3, 30  ;;  %v541_v11 = vsel %vm529_vm12, %v523_v34, %v540_v9  ;;  %v2772_v14 = vshrl.u32 %v2676_v54, 5  ;;  %v925_v15 = vcvt.s32.f32 %v918_v63 }
  0xd9   : > { %v923_v19 = vand.u32 2147483647, %v922_v4  ;;  %v542_v21 = vsel %vm528_vm13, %v539_v20, %v541_v11  ;;  %v2777_v49 = vsub.s32 32, %v2744_v40  ;;  %v2780_v17 = vand.u32 3, %v2752_v43 }
  0xda   : > { %v2782_v24 = vsub.s32 %v1058_v12, %v1061_v10  ;;  %v2786_v53 = vsel %vm528_vm13, %v535_v6, %v537_v7  ;;  %v544_v54 = vand.u32 65535, %v2769_v50  ;;  %v546_v29 = vand.u32 65535, %v542_v21 }
  0xdb   : > { %v926_v60 = vmul.f32 %v925_v15, %v923_v19  ;;  %v547_v33 = vshrl.u32 %v542_v21, 16  ;;  %v511_v16 = vshrl.u32 %v2407_v57, %v2698_v51  ;;  %v545_v31 = vshrl.u32 %v2769_v50, 16 }
  0xdc   : > { %vm1063_vm14 = vcmp.lt.s32.totalorder %v2782_v24, 0  ;;  %v1064_v30 = vsub.s32 0, %v2782_v24  ;;  %v1054_v34 = vadd.s32 %v2710_v38, %v2721_v22  ;;  %v532_v35 = vsel %vm530_vm10, %v520_v37, 2102212464 }
  0xdd   : > { %v927_v32 = vxor.u32 2147483648, %v926_v60  ;;  %v549_v36 = vmul.u32 %v547_v33, %v544_v54  ;;  %v531_v42 = vsel %vm527_vm11, %v511_v16, %v514_v46  ;;  %v2801_v45 = vmul.u32 %v546_v29, %v545_v31 }
  0xde   : > { %v1065_v39 = vsel %vm1063_vm14, %v1064_v30, %v2782_v24  ;;  %v569_v12 = vshrl.u32 %v2786_v53, 16  ;;  %v548_v52 = vmul.u32 %v546_v29, %v544_v54  ;;  %v533_v22 = vsel %vm529_vm12, %v517_v56, %v532_v35 }
  0xdf   : > { %v928_v51 = vsel %vm807_vm1, %v927_v32, %v926_v60  ;;  %v1066_v48 = vclz %v1065_v39  ;;  %v552_v58 = vshll.u32 %v549_v36, 16  ;;  %v551_v37 = vmul.u32 %v547_v33, %v545_v31 }
  0xe0   : > { %v2809_v38 = vsel %vm2717_vm7, %v2535_v25, %v928_v51  ;;  %v568_v46 = vand.u32 65535, %v2786_v53  ;;  %v1084_v63 = vsub.s32 4, %v2754_v3  ;;  %v554_v0 = vshll.u32 %v2801_v45, 16 }
  0xe1   : > { %v933_v55 = vmul.f32 %v2809_v38, %v2809_v38  ;;  %v2212_v41 = vadd.s32 4294967294, %v1066_v48  ;;  %vm556_vm15 = vc.u32 %v548_v52, %v552_v58  ;;  %v558_v61 = vadd.s32 %v552_v58, %v548_v52 }
  0xe2   : > { %v557_v47 = vsel %vm556_vm15, 1, %v2405_v2  ;;  %v571_v23 = vmul.u32 %v569_v12, %v544_v54  ;;  %vm962_vm0 = vcmp.lt.s32.totalorder %v2537_v26, 0  ;;  %v572_v7 = vmul.u32 %v568_v46, %v545_v31 }
  0xe3   : > { %v934_v20 = vmul.f32 -0.001358992, %v933_v55  ;;  %v941_v4 = vmul.f32 -0.00019511016, %v933_v55  ;;  %vm2213_vm1 = vcmp.lt.s32.totalorder %v2212_v41, 0  ;;  %v559_v56 = vadd.s32 %v557_v47, %v551_v37 }
  0xe4   : > { %v1069_v6 = vsel %vm2213_vm1, 0, %v2212_v41  ;;  %vm560_vm2 = vc.u32 %v558_v61, %v554_v0  ;;  %v574_v9 = vshll.u32 %v571_v23, 16  ;;  %v570_v15 = vmul.u32 %v568_v46, %v544_v54 }
  0xe5   : > { %v935_v10 = vadd.f32 0.041655596, %v934_v20  ;;  %v942_v11 = vadd.f32 0.008332121, %v941_v4  ;;  %v1070_v19 = vsub.s32 32, %v1069_v6  ;;  %v1071_v21 = vshll.u32 %v2782_v24, %v1069_v6 }
  0xe6   : > { %v1074_v53 = vsub.s32 4294967266, %v1069_v6  ;;  %v553_v60 = vshrl.u32 %v549_v36, 16  ;;  %v561_v29 = vsel %vm560_vm2, 1, %v2405_v2  ;;  %vm2824_vm3 = vcmp.le.f32.partialorder %v960_v44, 0.7853982 }
  0xe7   : > { %v936_v33 = vmul.f32 %v935_v10, %v933_v55  ;;  %v943_v30 = vmul.f32 %v942_v11, %v933_v55  ;;  %v1072_v16 = vshrl.u32 %v1054_v34, %v1070_v19  ;;  %v563_v32 = vadd.s32 %v561_v29, %v559_v56 }
  0xe8   : > { %v1075_v39 = vadd.s32 127, %v1074_v53  ;;  %v576_v51 = vshll.u32 %v572_v7, 16  ;;  %vm578_vm4 = vc.u32 %v570_v15, %v574_v9  ;;  %v580_v54 = vadd.s32 %v574_v9, %v570_v15 }
  0xe9   : > { %v937_v48 = vadd.f32 -0.4999988, %v936_v33  ;;  %v944_v24 = vadd.f32 -0.16666654, %v943_v30  ;;  %v564_v52 = vadd.s32 %v563_v32, %v553_v60  ;;  %v573_v36 = vmul.u32 %v569_v12, %v545_v31 }
  0xea   : > { %v1073_v58 = vor.u32 %v1072_v16, %v1071_v21  ;;  %v1076_v37 = vshll.u32 %v1075_v39, 23  ;;  %v579_v46 = vsel %vm578_vm4, 1, %v2405_v2  ;;  %vm582_vm5 = vc.u32 %v580_v54, %v576_v51 }
  0xeb   : > { %v938_v34 = vmul.f32 %v937_v48, %v933_v55  ;;  %v945_v41 = vmul.f32 %v944_v24, %v933_v55  ;;  %vm1572_vm6 = vcmp.lt.s32.totalorder %v2780_v17, 2  ;;  %v534_v44 = vsel %vm528_vm13, %v531_v42, %v533_v22 }
  0xec   : > { %v555_v61 = vshrl.u32 %v2801_v45, 16  ;;  %vm948_vm7 = vweird.f32 %v2535_v25  ;;  %v1077_v0 = vor.u32 4788187, %v1076_v37  ;;  %v1085_v31 = vsel %vm962_vm0, %v1084_v63, %v2754_v3 }
  0xed   : > { %v581_v12 = vadd.s32 %v579_v46, %v573_v36  ;;  %v583_v47 = vsel %vm582_vm5, 1, %v2405_v2  ;;  %v2838_v20 = vadd.f32 1.0, %v938_v34  ;;  %v946_v55 = vadd.f32 1.0, %v945_v41 }
  0xee   : > { %v2840_v4 = vadd.s32 %v564_v52, %v555_v61  ;;  %v575_v56 = vshrl.u32 %v571_v23, 16  ;;  %v1078_v18 = vand.u32 2147483647, %v1077_v0  ;;  %v1080_v42 = vcvt.s32.f32 %v1073_v58 }
  0xef   : > { %v585_v22 = vadd.s32 %v583_v47, %v581_v12  ;;  %v650_v45 = vand.u32 2147483647, %v2541_v28  ;;  %v2844_v6 = vmul.f32 %v946_v55, %v2809_v38  ;;  %v956_v9 = vxor.u32 2147483648, %v2838_v20 }
  0xf0   : > { %vm1573_vm8 = vcmp.eq.s32.totalorder %v2780_v17, 0  ;;  %v2848_v3 = vadd.s32 %v580_v54, %v576_v51  ;;  %vm1576_vm9 = vcmp.eq.s32.totalorder %v2780_v17, 2  ;;  %v1081_v63 = vmul.f32 %v1080_v42, %v1078_v18 }
  0xf1   : > { %v577_v10 = vshrl.u32 %v572_v7, 16  ;;  %v586_v11 = vadd.s32 %v585_v22, %v575_v56  ;;  %v953_v23 = vxor.u32 2147483648, %v2844_v6  ;;  %v2854_v19 = vsel %vm2824_vm3, 0, %v1085_v31 }
  0xf2   : > { %v588_v38 = vmul.u32 %v2769_v50, %v534_v44  ;;  %vm590_vm10 = vc.u32 %v2840_v4, %v2848_v3  ;;  %v1082_v15 = vxor.u32 2147483648, %v1081_v63  ;;  %v657_v53 = vand.u32 8388607, %v650_v45 }
  0xf3   : > { %v587_v21 = vadd.s32 %v586_v11, %v577_v10  ;;  %v667_v7 = vshll.u32 %v2407_v57, %v2744_v40  ;;  %v1575_v60 = vsel %vm1573_vm8, %v2838_v20, %v953_v23  ;;  %v1578_v29 = vsel %vm1576_vm9, %v956_v9, %v2844_v6 }
  0xf4   : > { %v668_v50 = vshrl.u32 %v2408_v59, %v2777_v49  ;;  %v671_v33 = vshrl.u32 %v2409_v62, %v2777_v49  ;;  %v1579_v30 = vsel %vm1572_vm6, %v1575_v60, %v1578_v29  ;;  %v1083_v16 = vsel %vm962_vm0, %v1082_v15, %v1081_v63 }
  0xf5   : > { %v591_v32 = vadd.s32 1, %v587_v21  ;;  %v674_v39 = vshrl.u32 %v2410_v1, %v2777_v49  ;;  %v1580_v51 = vsel %vm948_vm7, nan, %v1579_v30  ;;  %v1086_v54 = vsel %vm2824_vm3, %v2537_v26, %v1083_v16 }
  0xf6   : > { %v670_v48 = vshll.u32 %v2408_v59, %v2744_v40  ;;  %v673_v17 = vshll.u32 %v2409_v62, %v2744_v40  ;;  %1800 = vmatpush.msra.mxu0 %v1580_v51  ;;  %v1088_v24 = vmul.f32 %v1086_v54, %v1086_v54  ;;  %v676_v36 = vshll.u32 %v2410_v1, %v2744_v40 }
  0xf7   : > { %v592_v52 = vsel %vm590_vm10, %v591_v32, %v587_v21  ;;  %v677_v58 = vshrl.u32 %v2411_v5, %v2777_v49  ;;  %v679_v59 = vshll.u32 %v2411_v5, %v2744_v40  ;;  %v680_v62 = vshrl.u32 %v2412_v8, %v2777_v49 }
  0xf8   : > { %v593_v35 = vadd.s32 %v592_v52, %v588_v38  ;;  %v2895_v37 = vor.u32 %v671_v33, %v670_v48  ;;  %v1089_v46 = vmul.f32 -0.001358992, %v1088_v24  ;;  %v1096_v34 = vmul.f32 -0.00019511016, %v1088_v24 }
  0xf9   : > { %v2901_v41 = vor.u32 %v674_v39, %v673_v17  ;;  %v678_v44 = vor.u32 %v677_v58, %v676_v36  ;;  %v2903_v0 = vor.u32 %v668_v50, %v667_v7  ;;  %v681_v1 = vor.u32 %v680_v62, %v679_v59 }
  0xfa   : > { %v594_v61 = vadd.s32 536870912, %v593_v35  ;;  %v1090_v31 = vadd.f32 0.041655596, %v1089_v46  ;;  %v1097_v12 = vadd.f32 0.008332121, %v1096_v34  ;;  %v1725_v47 = vand.u32 3, %v2854_v19 }
  0xfb   : > { %vm685_vm11 = vcmp.lt.s32.totalorder %v2772_v14, 4  ;;  %v658_v5 = vor.u32 8388608, %v657_v53  ;;  %vm682_vm12 = vcmp.lt.s32.totalorder %v2772_v14, 1  ;;  %vm684_vm13 = vcmp.lt.s32.totalorder %v2772_v14, 3 }
  0xfc   : > { %v2907_v55 = vshrl.u32 %v594_v61, 30  ;;  %v691_v8 = vsel %vm685_vm11, %v678_v44, 920167782  ;;  %v1091_v40 = vmul.f32 %v1090_v31, %v1088_v24  ;;  %v1098_v56 = vmul.f32 %v1097_v12, %v1088_v24 }
  0xfd   : > { %v694_v18 = vsel %vm682_vm12, %v2895_v37, %v2901_v41  ;;  %v690_v22 = vsel %vm682_vm12, %v2903_v0, %v2895_v37  ;;  %v692_v63 = vsel %vm684_vm13, %v2901_v41, %v691_v8  ;;  %v695_v10 = vsel %vm685_vm11, %v681_v1, 1326507024 }
  0xfe   : > { %v596_v42 = vshll.u32 %v2907_v55, 30  ;;  %v1092_v11 = vadd.f32 -0.4999988, %v1091_v40  ;;  %v1099_v38 = vadd.f32 -0.16666654, %v1098_v56  ;;  %vm683_vm14 = vcmp.lt.s32.totalorder %v2772_v14, 2 }
  0xff   : > { %v696_v15 = vsel %vm684_vm13, %v678_v44, %v695_v10  ;;  %v2932_v7 = vshll.u32 %v658_v5, 8  ;;  %v693_v50 = vsel %vm683_vm14, %v690_v22, %v692_v63  ;;  %vm1103_vm15 = vweird.f32 %v2537_v26 }
 0x100   : > { %v597_v21 = vsub.s32 %v593_v35, %v596_v42  ;;  %v697_v53 = vsel %vm683_vm14, %v694_v18, %v696_v15  ;;  %v1093_v60 = vmul.f32 %v1092_v11, %v1088_v24  ;;  %v1100_v29 = vmul.f32 %v1099_v38, %v1088_v24 }
 0x101   : > { %vm1726_vm0 = vcmp.lt.s32.totalorder %v1725_v47, 2  ;;  %v701_v32 = vand.u32 65535, %v697_v53  ;;  %v702_v39 = vshrl.u32 %v697_v53, 16  ;;  %v699_v48 = vand.u32 65535, %v2932_v7 }
 0x102   : > { %vm598_vm1 = vcmp.lt.s32.totalorder %v597_v21, 0  ;;  %v599_v33 = vsub.s32 0, %v597_v21  ;;  %v2937_v30 = vadd.f32 1.0, %v1093_v60  ;;  %v1101_v16 = vadd.f32 1.0, %v1100_v29 }
 0x103   : > { %v700_v17 = vshrl.u32 %v2932_v7, 16  ;;  %v723_v52 = vand.u32 65535, %v693_v50  ;;  %vm1727_vm2 = vcmp.eq.s32.totalorder %v1725_v47, 0  ;;  %vm1730_vm3 = vcmp.eq.s32.totalorder %v1725_v47, 2 }
 0x104   : > { %v600_v51 = vsel %vm598_vm1, %v599_v33, %v597_v21  ;;  %v2941_v24 = vmul.f32 %v1101_v16, %v1086_v54  ;;  %v1111_v36 = vxor.u32 2147483648, %v2937_v30  ;;  %v704_v35 = vmul.u32 %v702_v39, %v699_v48 }
 0x105   : > { %v601_v58 = vclz %v600_v51  ;;  %v705_v59 = vmul.u32 %v701_v32, %v700_v17  ;;  %v724_v62 = vshrl.u32 %v693_v50, 16  ;;  %v589_v34 = vadd.s32 %v2848_v3, %v2840_v4 }
 0x106   : > { %v1108_v46 = vxor.u32 2147483648, %v2941_v24  ;;  %v703_v61 = vmul.u32 %v701_v32, %v699_v48  ;;  %v1732_v54 = vsel %vm1730_vm3, %v1111_v36, %v2941_v24  ;;  %v706_v1 = vmul.u32 %v702_v39, %v700_v17 }
 0x107   : > { %v2203_v44 = vadd.s32 4294967294, %v601_v58  ;;  %v707_v31 = vshll.u32 %v704_v35, 16  ;;  %v725_v12 = vmul.u32 %v723_v52, %v699_v48  ;;  %v709_v8 = vshll.u32 %v705_v59, 16 }
 0x108   : > { %v1729_v5 = vsel %vm1727_vm2, %v2937_v30, %v1108_v46  ;;  %v726_v40 = vmul.u32 %v724_v62, %v699_v48  ;;  %v727_v63 = vmul.u32 %v723_v52, %v700_v17  ;;  %v708_v29 = vshrl.u32 %v704_v35, 16 }
 0x109   : > { %vm2204_vm4 = vcmp.lt.s32.totalorder %v2203_v44, 0  ;;  %v1733_v56 = vsel %vm1726_vm0, %v1729_v5, %v1732_v54  ;;  %vm711_vm5 = vc.u32 %v703_v61, %v707_v31  ;;  %v713_v4 = vadd.s32 %v707_v31, %v703_v61 }
 0x10a   : > { %v604_v18 = vsel %vm2204_vm4, 0, %v2203_v44  ;;  %v1734_v3 = vsel %vm1103_vm15, nan, %v1733_v56  ;;  %v712_v11 = vsel %vm711_vm5, 1, %v2405_v2  ;;  %v729_v38 = vshll.u32 %v726_v40, 16 }
 0x10b   : > { %v605_v42 = vsub.s32 32, %v604_v18  ;;  %v609_v22 = vsub.s32 4294967266, %v604_v18  ;;  %1829 = vmatpush.msra.mxu1 %v1734_v3  ;;  %v606_v10 = vshll.u32 %v597_v21, %v604_v18  ;;  %vm715_vm6 = vc.u32 %v713_v4, %v709_v8 }
 0x10c   : > { %v714_v60 = vadd.s32 %v712_v11, %v706_v1  ;;  %v716_v47 = vsel %vm715_vm6, 1, %v2405_v2  ;;  %v728_v50 = vmul.u32 %v724_v62, %v700_v17  ;;  %vm733_vm8 = vc.u32 %v725_v12, %v729_v38 }
 0x10d   : > { %v607_v15 = vshrl.u32 %v589_v34, %v605_v42  ;;  %v610_v53 = vadd.s32 127, %v609_v22  ;;  %v734_v39 = vsel %vm733_vm8, 1, %v2405_v2  ;;  %v731_v51 = vshll.u32 %v727_v63, 16 }
 0x10e   : > { %v718_v32 = vadd.s32 %v716_v47, %v714_v60  ;;  %v735_v48 = vadd.s32 %v729_v38, %v725_v12  ;;  %v736_v21 = vadd.s32 %v734_v39, %v728_v50  ;;  %v666_v34 = vshrl.u32 %v2407_v57, %v2777_v49 }
 0x10f   : > { %v608_v33 = vor.u32 %v607_v15, %v606_v10  ;;  %v611_v16 = vshll.u32 %v610_v53, 23  ;;  %v687_v44 = vsel %vm685_vm11, %v2901_v41, 2102212464  ;;  %v710_v62 = vshrl.u32 %v705_v59, 16 }
 0x110   : > { %v719_v58 = vadd.s32 %v718_v32, %v708_v29  ;;  %vm737_vm9 = vc.u32 %v735_v48, %v731_v51  ;;  %v730_v54 = vshrl.u32 %v726_v40, 16  ;;  %v686_v12 = vsel %vm682_vm12, %v666_v34, %v2903_v0 }
 0x111   : > { %v612_v52 = vor.u32 4788187, %v611_v16  ;;  %v615_v35 = vcvt.s32.f32 %v608_v33  ;;  %v738_v61 = vsel %vm737_vm9, 1, %v2405_v2  ;;  %v688_v57 = vsel %vm684_vm13, %v2895_v37, %v687_v44 }
 0x112   : > { %v740_v1 = vadd.s32 %v738_v61, %v736_v21  ;;  %v720_v49 = vadd.s32 %v719_v58, %v710_v62  ;;  %v732_v5 = vshrl.u32 %v727_v63, 16  ;;  %v739_v56 = vadd.s32 %v735_v48, %v731_v51 }
 0x113   : > { %v613_v17 = vand.u32 2147483647, %v612_v52  ;;  %vm497_vm10 = vcmp.lt.s32.totalorder %v2539_v27, 0  ;;  %v689_v2 = vsel %vm683_vm14, %v686_v12, %v688_v57  ;;  %vm2976_vm11 = vcmp.le.f32.partialorder %v495_v13, 0.7853982 }
 0x114   : > { %v741_v41 = vadd.s32 %v740_v1, %v730_v54  ;;  %vm745_vm12 = vc.u32 %v720_v49, %v739_v56  ;;  %v743_v14 = vmul.u32 %v2932_v7, %v689_v2  ;;  %v619_v13 = vsub.s32 4, %v2907_v55 }
 0x115   : > { %v616_v31 = vmul.f32 %v615_v35, %v613_v17  ;;  %v1104_v62 = vadd.s32 3, %v2854_v19  ;;  %vm638_vm2 = vweird.f32 %v2539_v27  ;;  %v744_v19 = vadd.s32 %v739_v56, %v720_v49 }
 0x116   : > { %v742_v59 = vadd.s32 %v741_v41, %v732_v5  ;;  %v620_v47 = vsel %vm497_vm10, %v619_v13, %v2907_v55  ;;  %v949_v55 = vadd.s32 3, %v2752_v43  ;;  %v3032_v13 = vld [vmem:[%s3020_s19] sm:$0xff] }
 0x117   : > { %v617_v8 = vxor.u32 2147483648, %v616_v31  ;;  %v622_v33 = vsel %vm2976_vm11, 0, %v620_v47  ;;  %v1105_v41 = vand.u32 3, %v1104_v62 }
 0x118   : > { %v746_v18 = vadd.s32 1, %v742_v59  ;;  %v1263_v52 = vand.u32 3, %v622_v33  ;;  %v639_v54 = vadd.s32 3, %v622_v33  ;;  %v950_v12 = vand.u32 3, %v949_v55 }
 0x119   : > { %v618_v37 = vsel %vm497_vm10, %v617_v8, %v616_v31  ;;  %vm1106_vm8 = vcmp.lt.s32.totalorder %v1105_v41, 2  ;;  %vm1107_vm9 = vcmp.eq.s32.totalorder %v1105_v41, 0  ;;  %vm1110_vm10 = vcmp.eq.s32.totalorder %v1105_v41, 2 }
 0x11a   : > { %v621_v0 = vsel %vm2976_vm11, %v2539_v27, %v618_v37  ;;  %v747_v3 = vsel %vm745_vm12, %v746_v18, %v742_v59  ;;  %vm1265_vm14 = vcmp.eq.s32.totalorder %v1263_v52, 0  ;;  %vm1268_vm0 = vcmp.eq.s32.totalorder %v1263_v52, 2 }
 0x11b   : > { %v623_v4 = vmul.f32 %v621_v0, %v621_v0  ;;  %v748_v63 = vadd.s32 %v747_v3, %v743_v14  ;;  %vm1264_vm1 = vcmp.lt.s32.totalorder %v1263_v52, 2  ;;  %v640_v59 = vand.u32 3, %v639_v54  ;;  %v1746_v52 = vld [vmem:[%s3048_s22 + $0x18] sm:$0xff] }
 0x11c   : > { %vm951_vm4 = vcmp.lt.s32.totalorder %v950_v12, 2  ;;  %vm952_vm5 = vcmp.eq.s32.totalorder %v950_v12, 0  ;;  %vm955_vm6 = vcmp.eq.s32.totalorder %v950_v12, 2  ;;  %v1109_v14 = vsel %vm1107_vm9, %v2937_v30, %v1108_v46  ;;  %1772 = vperm.xlu2 %2322, %v1746_v52   ;;  %v1742_v54 = vld [vmem:[%s3020_s19 + $0x18] sm:$0xff] }
 0x11d   : > { %v624_v42 = vmul.f32 -0.001358992, %v623_v4  ;;  %v631_v22 = vmul.f32 -0.00019511016, %v623_v4  ;;  %v749_v38 = vadd.s32 536870912, %v748_v63  ;;  %vm641_vm11 = vcmp.lt.s32.totalorder %v640_v59, 2 }
 0x11e   : > { %vm642_vm12 = vcmp.eq.s32.totalorder %v640_v59, 0  ;;  %v954_v49 = vsel %vm952_vm5, %v2838_v20, %v953_v23  ;;  %v957_v56 = vsel %vm955_vm6, %v956_v9, %v2844_v6  ;;  %v1112_v3 = vsel %vm1110_vm10, %v1111_v36, %v2941_v24 }
 0x11f   : > { %v625_v10 = vadd.f32 0.041655596, %v624_v42  ;;  %v632_v11 = vadd.f32 0.008332121, %v631_v22  ;;  %v2987_v60 = vshrl.u32 %v749_v38, 30  ;;  %v958_v22 = vsel %vm951_vm4, %v954_v49, %v957_v56 }
 0x120   : > { %v959_v20 = vsel %vm948_vm7, nan, %v958_v22  ;;  %vm652_vm7 = vcmp.lt.s32.totalorder %v2541_v28, 0  ;;  %vm793_vm4 = vweird.f32 %v2541_v28 }
 0x121   : > { %v626_v15 = vmul.f32 %v625_v10, %v623_v4  ;;  %v633_v53 = vmul.f32 %v632_v11, %v623_v4  ;;  %v751_v7 = vshll.u32 %v2987_v60, 30  ;;  %v774_v11 = vsub.s32 4, %v2987_v60 }
 0x123   : > { %v627_v29 = vadd.f32 -0.4999988, %v626_v15  ;;  %v634_v50 = vadd.f32 -0.16666654, %v633_v53  ;;  %v752_v39 = vsub.s32 %v748_v63, %v751_v7  ;;  %v1113_v63 = vsel %vm1106_vm8, %v1109_v14, %v1112_v3  ;;  %v1740_v15 = vld [vmem:[%s3020_s19 + $0x8] sm:$0xff] }
 0x124   : > { %v3026_v6 = vsel %vm1103_vm15, nan, %v1113_v63  ;;  %vm651_vm15 = vcmp.le.f32.partialorder %v650_v45, 0.7853982  ;;  %vm2013_vm8 = vcmask 1043456  }
 0x125   : > { %v628_v16 = vmul.f32 %v627_v29, %v623_v4  ;;  %v635_v32 = vmul.f32 %v634_v50, %v623_v4  ;;  %vm753_vm13 = vcmp.lt.s32.totalorder %v752_v39, 0  ;;  %v754_v21 = vsub.s32 0, %v752_v39 }
 0x126   : > { %v775_v29 = vsel %vm652_vm7, %v774_v11, %v2987_v60 }
 0x127   : > { %v629_v51 = vadd.f32 1.0, %v628_v16  ;;  %v636_v48 = vadd.f32 1.0, %v635_v32  ;;  %v755_v44 = vsel %vm753_vm13, %v754_v21, %v752_v39  ;;  %vm645_vm13 = vcmp.eq.s32.totalorder %v640_v59, 2  ;;  %v1743_v59 = vld [vmem:[%s3048_s22] sm:$0xff] }
 0x128   : > { %v756_v17 = vclz %v755_v44  ;;  %v777_v33 = vsel %vm651_vm15, 0, %v775_v29  ;;  %v1861_v29 = vld [vmem:[%s3058_s26 + $0x18] sm:$0xff] }
 0x129   : > { %v637_v58 = vmul.f32 %v636_v48, %v621_v0  ;;  %v646_v34 = vxor.u32 2147483648, %v629_v51  ;;  %v794_v48 = vadd.s32 3, %v777_v33  ;;  %v1417_v55 = vand.u32 3, %v777_v33  ;;  %1879 = vperm.xlu0 %2324, %v1861_v29  }
 0x12a   : > { %v2206_v61 = vadd.s32 4294967294, %v756_v17 }
 0x12b   : > { %v643_v35 = vxor.u32 2147483648, %v637_v58  ;;  %v1270_v31 = vsel %vm1268_vm0, %v646_v34, %v637_v58  ;;  %v647_v23 = vsel %vm645_vm13, %v646_v34, %v637_v58  ;;  %v1744_v58 = vld [vmem:[%s3048_s22 + $0x8] sm:$0xff]  ;;  %v795_v17 = vand.u32 3, %v794_v48 }
 0x12c   : > { %vm2207_vm3 = vcmp.lt.s32.totalorder %v2206_v61, 0  ;;  %1762 = vperm.xlu1 %2323, %v1744_v58   ;;  %vm1419_vm0 = vcmp.eq.s32.totalorder %v1417_v55, 0 }
 0x12d   : > { %v1267_v1 = vsel %vm1265_vm14, %v629_v51, %v643_v35  ;;  %v759_v43 = vsel %vm2207_vm3, 0, %v2206_v61  ;;  %v644_v9 = vsel %vm642_vm12, %v629_v51, %v643_v35  ;;  %vm1775_vm14 = vcmask 261120   ;;  %v1741_v51 = vld [vmem:[%s3020_s19 + $0x10] sm:$0xff]  ;;  %s409_s19 = scalar_lea.vmem [#allocation3], %s2189_s25  ;;  %s2345_s25 = scalar_lea.hbm %s3142_s8, 16 }
 0x12e   : > { %v1271_v57 = vsel %vm1264_vm1, %v1267_v1, %v1270_v31  ;;  %v760_v8 = vsub.s32 32, %v759_v43  ;;  %v764_v2 = vsub.s32 4294967266, %v759_v43  ;;  %v761_v40 = vshll.u32 %v752_v39, %v759_v43  ;;  %s2033_s20 = sshll.u32 %s409_s19, 4  ;;  %s2034_s20 = int_to_ptr.vmem [resolvable:$true] %s2033_s20 }
 0x12f   : > { %v1272_v5 = vsel %vm638_vm2, nan, %v1271_v57  ;;  %v648_v36 = vsel %vm641_vm11, %v644_v9, %v647_v23  ;;  %vm1422_vm1 = vcmp.eq.s32.totalorder %v1417_v55, 2  ;;  %vm1418_vm3 = vcmp.lt.s32.totalorder %v1417_v55, 2  ;;  %v1745_v57 = vld [vmem:[%s3048_s22 + $0x10] sm:$0xff] }
 0x130   : > { %1801 = vmatpush.msra.mxu0 %v1272_v5  ;;  %v762_v37 = vshrl.u32 %v744_v19, %v760_v8  ;;  %v765_v0 = vadd.s32 127, %v764_v2  ;;  %v649_v46 = vsel %vm638_vm2, nan, %v648_v36  ;;  %vm797_vm2 = vcmp.eq.s32.totalorder %v795_v17, 0  ;;  %v1860_v5 = vld [vmem:[%s3058_s26 + $0x10] sm:$0xff]  ;;  %1767 = vperm.xlu2 %2322, %v1745_v57  }
 0x131   : > { %vm800_vm5 = vcmp.eq.s32.totalorder %v795_v17, 2  ;;  %vm796_vm6 = vcmp.lt.s32.totalorder %v795_v17, 2 }
 0x132   : > { %v763_v18 = vor.u32 %v762_v37, %v761_v40  ;;  %v766_v4 = vshll.u32 %v765_v0, 23  ;;  %1802 = vmatpush.msra.mxu0 %v959_v20  ;;  %v1858_v40 = vld [vmem:[%s3058_s26] sm:$0xff] }
 0x133   : > { %v1961_v37 = vld [vmem:[%s447_s16] sm:$0xf] }
 0x134   : > { %v767_v42 = vor.u32 4788187, %v766_v4  ;;  %v770_v24 = vcvt.s32.f32 %v763_v18  ;;  %1803 = vmatpush.msra.mxu0 %v649_v46  ;;  %1874 = vperm.xlu1 %2323, %v1860_v5   ;;  %v1854_v46 = vld [vmem:[%s434_s21] sm:$0xff] }
 0x135   : > { %2226 = vmatmul.msk.f32.vlgmr.msra.gmra.mxu0 %vm1775_vm14, %v3032_v13 }
 0x136   : > { %v768_v30 = vand.u32 2147483647, %v767_v42 }
 0x138   : > { %v771_v25 = vmul.f32 %v770_v24, %v768_v30  ;;  %1757 = vperm.xlu2 %2322, %v1743_v59  }
 0x13a   : > { %v772_v26 = vxor.u32 2147483648, %v771_v25 }
 0x13c   : > { %v773_v10 = vsel %vm652_vm7, %v772_v26, %v771_v25  ;;  %1864 = vperm.xlu1 %2323, %v1858_v40   ;;  %v1855_v25 = vld [vmem:[%s434_s21 + $0x8] sm:$0xff] }
 0x13d   : > { %v776_v27 = vsel %vm651_vm15, %v2541_v28, %v773_v10  ;;  %2227 = vmatmul.msk.f32.gmra.mxu0 %vm1775_vm14, %v1740_v15  ;;  %v1859_v28 = vld [vmem:[%s3058_s26 + $0x8] sm:$0xff]  ;;  %v1856_v10 = vld [vmem:[%s434_s21 + $0x10] sm:$0xff]  ;;  %s2254_s26 = sshll.u32 %s2395_s30, 3  ;;  %s2018_s30 = scalar_lea.sflag [#allocation4], %s407_s24 }
 0x13e   : > { %v778_v38 = vmul.f32 %v776_v27, %v776_v27  ;;  %s2031_s16 = scalar_lea.hbm %s3142_s8, %s2254_s26 }
 0x140   : > { %v779_v53 = vmul.f32 -0.001358992, %v778_v38  ;;  %v786_v47 = vmul.f32 -0.00019511016, %v778_v38  ;;  %1869 = vperm.xlu2 %2322, %v1859_v28  }
 0x142   : > { %v780_v50 = vadd.f32 0.041655596, %v779_v53  ;;  %v787_v7 = vadd.f32 0.008332121, %v786_v47 }
 0x144   : > { %v781_v16 = vmul.f32 %v780_v50, %v778_v38  ;;  %v788_v32 = vmul.f32 %v787_v7, %v778_v38 }
 0x145   : > { %2228 = vmatmul.msk.f32.gmra.mxu0 %vm1775_vm14, %v1741_v51 }
 0x146   : > { %v782_v45 = vadd.f32 -0.4999988, %v781_v16  ;;  %v789_v39 = vadd.f32 -0.16666654, %v788_v32 }
 0x148   : > { %v783_v60 = vmul.f32 %v782_v45, %v778_v38  ;;  %v790_v21 = vmul.f32 %v789_v39, %v778_v38  ;;  %1964 = vperm.xlu2 %2322, %v1961_v37  }
 0x14a   : > { %v784_v34 = vadd.f32 1.0, %v783_v60  ;;  %v791_v44 = vadd.f32 1.0, %v790_v21 }
 0x14c   : > { %v792_v35 = vmul.f32 %v791_v44, %v776_v27  ;;  %v801_v62 = vxor.u32 2147483648, %v784_v34 }
 0x14d   : > { %2229 = vmatmul.msk.f32.gmra.mxu0 %vm1775_vm14, %v1742_v54 }
 0x14e   : > { %v798_v61 = vxor.u32 2147483648, %v792_v35  ;;  %v1424_v31 = vsel %vm1422_vm1, %v801_v62, %v792_v35  ;;  %v802_v19 = vsel %vm800_vm5, %v801_v62, %v792_v35 }
 0x150   : > { %v1421_v1 = vsel %vm1419_vm0, %v784_v34, %v798_v61  ;;  %v799_v12 = vsel %vm797_vm2, %v784_v34, %v798_v61 }
 0x151   : > { %v1425_v43 = vsel %vm1418_vm3, %v1421_v1, %v1424_v31  ;;  %v803_v8 = vsel %vm796_vm6, %v799_v12, %v802_v19  ;;  %v1960_v1 = vld [vmem:[%s443_s23] sm:$0xf] }
 0x152   : > { %v1426_v41 = vsel %vm793_vm4, nan, %v1425_v43  ;;  %v804_v2 = vsel %vm793_vm4, nan, %v803_v8 }
 0x153   : > { %1830 = vmatpush.msra.mxu1 %v1426_v41 }
 0x155   : > { %1831 = vmatpush.msra.mxu1 %v3026_v6 }
 0x157   : > { %1832 = vmatpush.msra.mxu1 %v804_v2 }
 0x158   : > { %2230 = vmatmul.msk.f32.vlgmr.msra.gmra.mxu1 %vm1775_vm14, %v3032_v13 }
 0x160   : > { %2231 = vmatmul.msk.f32.gmra.mxu1 %vm1775_vm14, %v1740_v15  ;;  %v1857_v15 = vld [vmem:[%s434_s21 + $0x18] sm:$0xff]  ;;  %s2035_s21 = sshll.u32 %s2031_s16, 4  ;;  %s2036_s21 = int_to_ptr.hbm [resolvable:$true] %s2035_s21 }
 0x161   : > { %s2339_s12 = sshra.s32 %s2036_s21, 4  ;;  %s2340_s12 = int_to_ptr.hbm [resolvable:$true] %s2339_s12 }
 0x162   : > { %s2341_s22 = scalar_lea.hbm %s2340_s12, 8  ;;  %p2346_p1 = scmp.lt.s32.totalorder %s2340_s12, %s3142_s8 }
 0x163   : > { %p2342_p12 = scmp.ne.s32.totalorder %s2340_s12, %s2341_s22  ;;  %p2347_p2 = scmp.lt.s32.totalorder %s2345_s25, %s2341_s22 }
 0x165   : > { %p2343_p13 = pnand %p2342_p12, %p2498_p4  ;;  %p2348_p3 = por %p2347_p2, %p2346_p1 }
 0x167   : > { %p2344_p0 = pneg %p2343_p13 }
 0x168   : > { %2232 = vmatmul.msk.f32.gmra.mxu1 %vm1775_vm14, %v1741_v51 }
 0x169   : > { %p2349_p5 = pnand %p2348_p3, %p2344_p0 }
 0x170   : > { %2233 = vmatmul.msk.f32.gmra.mxu1 %vm1775_vm14, %v1742_v54 }
 0x176   : > { %v1773_v18 = vpop.permute.xlu2 %1772 }
 0x18a   : > { %v1768_v56 = vpop.permute.xlu2 %1767 }
 0x192   : > { %v1758_v6 = vpop.permute.xlu2 %1757 }
 0x19a   : > { %v1870_v58 = vpop.permute.xlu2 %1869 }
 0x19b   : > { %v1880_v48 = vpop.permute.xlu0 %1879 }
 0x19e   : > { %v1763_v22 = vpop.permute.xlu1 %1762 }
 0x1a2   : > { %v1965_v28 = vpop.permute.xlu2 %1964 }
 0x1a6   : > { %v1875_v51 = vpop.permute.xlu1 %1874 }
 0x1ae   : > { %v1865_v55 = vpop.permute.xlu1 %1864 }
 0x1b2   : > { %v1805_v0 = vpop.f32.mrf.mxu0 }
 0x1b3   : > { %v1806_v9 = vadd.f32 %v1805_v0, %v1758_v6 }
 0x1b5   : > { %v1846_v36 = vmax.f32 %v1806_v9, 0.0 }
 0x1ba   : > { %v1808_v4 = vpop.f32.mrf.mxu0 }
 0x1bb   : > { %v1809_v63 = vadd.f32 %v1808_v4, %v1763_v22 }
 0x1bd   : > { %v1848_v24 = vmax.f32 %v1809_v63, 0.0 }
 0x1c2   : > { %v1811_v49 = vpop.f32.mrf.mxu0 }
 0x1c3   : > { %v1812_v3 = vadd.f32 %v1811_v49, %v1768_v56 }
 0x1c5   : > { %v1850_v23 = vmax.f32 %v1812_v3, 0.0 }
 0x1ca   : > { %v1814_v14 = vpop.f32.mrf.mxu0 }
 0x1cb   : > { %v1815_v42 = vadd.f32 %v1814_v14, %v1773_v18 }
 0x1cd   : > { %v1852_v20 = vmax.f32 %v1815_v42, 0.0 }
 0x1cf   : > { %1906 = vmatpush.msra.mxu2 %v1852_v20 }
 0x1d1   : > { %1907 = vmatpush.msra.mxu2 %v1850_v23 }
 0x1d3   : > { %1908 = vmatpush.msra.mxu2 %v1848_v24 }
 0x1d5   : > { %v1834_v30 = vpop.f32.mrf.mxu1  ;;  %1909 = vmatpush.msra.mxu2 %v1846_v36 }
 0x1d6   : > { %2234 = vmatmul.msk.f32.vlgmr.msra.gmra.mxu2 %vm1775_vm14, %v1854_v46  ;;  %v1835_v50 = vadd.f32 %v1834_v30, %v1758_v6 }
 0x1d8   : > { %v1847_v16 = vmax.f32 %v1835_v50, 0.0 }
 0x1dd   : > { %v1837_v13 = vpop.f32.mrf.mxu1 }
 0x1de   : > { %2235 = vmatmul.msk.f32.gmra.mxu2 %vm1775_vm14, %v1855_v25  ;;  %v1838_v53 = vadd.f32 %v1837_v13, %v1763_v22 }
 0x1e0   : > { %v1849_v33 = vmax.f32 %v1838_v53, 0.0 }
 0x1e5   : > { %v1840_v26 = vpop.f32.mrf.mxu1 }
 0x1e6   : > { %2236 = vmatmul.msk.f32.gmra.mxu2 %vm1775_vm14, %v1856_v10  ;;  %v1841_v27 = vadd.f32 %v1840_v26, %v1768_v56 }
 0x1e8   : > { %v1851_v7 = vmax.f32 %v1841_v27, 0.0 }
 0x1ed   : > { %v1843_v11 = vpop.f32.mrf.mxu1 }
 0x1ee   : > { %v1844_v38 = vadd.f32 %v1843_v11, %v1773_v18  ;;  %2237 = vmatmul.msk.f32.gmra.mxu2 %vm1775_vm14, %v1857_v15 }
 0x1f0   : > { %v1853_v47 = vmax.f32 %v1844_v38, 0.0 }
 0x1f2   : > { %1935 = vmatpush.msra.mxu3 %v1853_v47 }
 0x1f4   : > { %1936 = vmatpush.msra.mxu3 %v1851_v7 }
 0x1f6   : > { %1937 = vmatpush.msra.mxu3 %v1849_v33 }
 0x1f8   : > { %1938 = vmatpush.msra.mxu3 %v1847_v16 }
 0x1f9   : > { %2238 = vmatmul.msk.f32.vlgmr.msra.gmra.mxu3 %vm1775_vm14, %v1854_v46 }
 0x201   : > { %2239 = vmatmul.msk.f32.gmra.mxu3 %vm1775_vm14, %v1855_v25 }
 0x209   : > { %2240 = vmatmul.msk.f32.gmra.mxu3 %vm1775_vm14, %v1856_v10 }
 0x211   : > { %2241 = vmatmul.msk.f32.gmra.mxu3 %vm1775_vm14, %v1857_v15 }
 0x259   : > { %v1911_v32 = vpop.f32.mrf.mxu2 }
 0x25a   : > { %v1912_v17 = vadd.f32 %v1911_v32, %v1865_v55 }
 0x25c   : > { %v1952_v54 = vmax.f32 %v1912_v17, 0.0 }
 0x261   : > { %v1914_v45 = vpop.f32.mrf.mxu2 }
 0x262   : > { %v1915_v34 = vadd.f32 %v1914_v45, %v1870_v58 }
 0x264   : > { %v1954_v61 = vmax.f32 %v1915_v34, 0.0 }
 0x269   : > { %v1917_v39 = vpop.f32.mrf.mxu2 }
 0x26a   : > { %v1918_v21 = vadd.f32 %v1917_v39, %v1875_v51 }
 0x26c   : > { %v1956_v35 = vmax.f32 %v1918_v21, 0.0 }
 0x271   : > { %v1920_v60 = vpop.f32.mrf.mxu2 }
 0x272   : > { %v1921_v52 = vadd.f32 %v1920_v60, %v1880_v48 }
 0x274   : > { %v1958_v44 = vmax.f32 %v1921_v52, 0.0 }
 0x276   : > { %1982 = vmatpush.msrb.mxu0 %v1958_v44 }
 0x278   : > { %1983 = vmatpush.msrb.mxu0 %v1956_v35 }
 0x27a   : > { %1984 = vmatpush.msrb.mxu0 %v1954_v61 }
 0x27c   : > { %v1940_v62 = vpop.f32.mrf.mxu3  ;;  %1985 = vmatpush.msrb.mxu0 %v1952_v54 }
 0x27d   : > { %2242 = vmatmul.msk.f32.vlgmr.msrb.gmra.mxu0 %vm1775_vm14, %v1960_v1  ;;  %v1941_v8 = vadd.f32 %v1940_v62, %v1865_v55 }
 0x27f   : > { %v1953_v40 = vmax.f32 %v1941_v8, 0.0 }
 0x284   : > { %v1943_v31 = vpop.f32.mrf.mxu3 }
 0x285   : > { %v1944_v41 = vadd.f32 %v1943_v31, %v1870_v58 }
 0x287   : > { %v1955_v59 = vmax.f32 %v1944_v41, 0.0 }
 0x28c   : > { %v1946_v12 = vpop.f32.mrf.mxu3 }
 0x28d   : > { %v1947_v5 = vadd.f32 %v1946_v12, %v1875_v51 }
 0x28f   : > { %v1957_v2 = vmax.f32 %v1947_v5, 0.0 }
 0x294   : > { %v1949_v57 = vpop.f32.mrf.mxu3 }
 0x295   : > { %v1950_v43 = vadd.f32 %v1949_v57, %v1880_v48 }
 0x297   : > { %v1959_v19 = vmax.f32 %v1950_v43, 0.0 }
 0x299   : > { %2002 = vmatpush.msrb.mxu1 %v1959_v19 }
 0x29b   : > { %2003 = vmatpush.msrb.mxu1 %v1957_v2 }
 0x29d   : > { %2004 = vmatpush.msrb.mxu1 %v1955_v59 }
 0x29f   : > { %2005 = vmatpush.msrb.mxu1 %v1953_v40 }
 0x2a0   : > { %2243 = vmatmul.msk.f32.vlgmr.msrb.gmra.mxu1 %vm1775_vm14, %v1960_v1 }
 0x2fa   : > { %v1987_v37 = vpop.f32.mrf.mxu0 }
 0x2fb   : > { %v1988_v4 = vadd.f32 %v1987_v37, %v1965_v28 }
 0x31d   : > { %v2007_v0 = vpop.f32.mrf.mxu1 }
 0x31e   : > { %v2008_v18 = vadd.f32 %v2007_v0, %v1965_v28 }
 0x320   : > { %v2012_v49 = vrot.slane %v2008_v18, 4 }
 0x322   : > { %v2014_v56 = vsel %vm2013_vm8, %v1988_v4, %v2012_v49 }
 0x323   : > { %2016 = vst [vmem:[%s409_s19] sm:$0xff] %v2014_v56 }
 0x324   : > { %2352 = shalt.err (!%p2349_p5)
}
 0x325   : > { %2255 = dma.vmem_to_hbm [thread:$0]  (%p2498_p4), %s2034_s20, 128, %s2036_s21, %s2018_s30  }
 0x326 PF: > { %p2261_p6 = scmp.ge.s32.totalorder %s2403_s10, 2  ;;  %s2047_s24 = sand.u32 1, %s2383_s27  }
 0x327   : > { %s2048_s16 = scalar_lea.sflag [#allocation4], %s2047_s24 }
 0x328   : > { %p2258_p7 = pnand %p2261_p6, %p2505_p8 }
 0x32a   : > { %p2259_p9 = pneg %p2258_p7 }
 0x32c   : > { %2378 = dma.done.wait (%p2259_p9), %s2048_s16, 128  }
 0x32d   : > { %2380 = vsyncadd (%p2259_p9), %s2048_s16, 4294967168  ;;  %s21_s10 = sadd.s32 1, %s2403_s10   ;;  %s3151_s27 = smov %s2387_s28 }
 0x32e   : > { %p18_p10 = scmp.ge.s32.totalorder %s21_s10, 4   ;;  %s3152_s28 = smov %s2391_s29 }
 0x32f   : > { %s3153_s29 = smov %s2511_s18  ;;  %s3154_s30 = smov %s2399_s9 }
 0x330   : > { %s3155_s9 = smov %s3157_s13  ;;  %20 = sbr.rel (!%p18_p10) target bundleno = 4 (0x4), region = 105 }
 0x335   :  { %2054 = vsyncpa [#allocation4], 1 }
 0x336   :  { %2056 = vsyncpa [#allocation4 + $0x1], 1 }

</bundles_post_ra>
